<compile_context>
chip_gen: v5e
topology: v5e:2x2
jax: 0.10.0
libtpu: 0.0.40
codegen_flags: <defaults>
</compile_context>

<pallas_src>
import math
import functools

import jax
import jax.numpy as jnp
from jax.experimental import pallas as pl
from jax.experimental.pallas import tpu as pltpu


def _transformer_kernel(x_ref, pe_ref, w_in_ref, b_in_ref,
                        wqkv_ref, bqkv_ref, wo_ref, bo_ref,
                        ln1w_ref, ln1b_ref, w1_ref, b1_ref, w2_ref, b2_ref,
                        ln2w_ref, ln2b_ref, w_out_ref, b_out_ref,
                        o_ref, *, nhead):
    bb, S, IN = x_ref.shape                 # x block: (bb, S, input_size)
    D = w_in_ref.shape[1]
    L = wqkv_ref.shape[0]
    hd = D // nhead
    f32 = jnp.float32

    def layernorm(x, w, b, eps=1e-5):       # biased variance == nn.LayerNorm
        mu = jnp.mean(x, axis=-1, keepdims=True)
        var = jnp.mean((x - mu) ** 2, axis=-1, keepdims=True)
        return (x - mu) * jax.lax.rsqrt(var + eps) * w + b

    def encoder_layer(h_rows, l, last_only):
        """Post-norm TransformerEncoderLayer on (rows, D) activations."""
        # Fused Q/K/V projection: one (rows, D) x (D, 3D) matmul.  The Q
        # columns already carry the 1/sqrt(head_dim) scale.
        qkv = (jnp.dot(h_rows, wqkv_ref[l], preferred_element_type=f32)
               + bqkv_ref[l])                                  # (bb*S, 3D)
        qkv = qkv.reshape(bb, S, 3 * D)
        q3 = qkv[:, :, 0:D]
        k3 = qkv[:, :, D:2 * D]
        v3 = qkv[:, :, 2 * D:3 * D]
        if last_only:
            # Only the last token feeds the classifier: restrict queries,
            # residual and FFN to that row (K/V still use all S tokens).
            q3 = q3[:, S - 1:S, :]
            res = h_rows.reshape(bb, S, D)[:, S - 1:S, :].reshape(bb, D)
        else:
            res = h_rows
        Sq = q3.shape[1]

        # Per-head attention; sequences are batched in the einsum batch dim.
        ctx_heads = []
        for hh in range(nhead):
            sl = slice(hh * hd, (hh + 1) * hd)
            s = jnp.einsum('bqd,bkd->bqk', q3[:, :, sl], k3[:, :, sl],
                           preferred_element_type=f32)
            s = s - jnp.max(s, axis=-1, keepdims=True)
            p = jnp.exp(s)
            p = p / jnp.sum(p, axis=-1, keepdims=True)
            ctx_heads.append(jnp.einsum('bqk,bkd->bqd', p, v3[:, :, sl],
                                        preferred_element_type=f32))
        # Head merge fused into one (rows, D) x (D, D) matmul.
        ctx = jnp.concatenate(ctx_heads, axis=-1).reshape(bb * Sq, D)
        attn = jnp.dot(ctx, wo_ref[l], preferred_element_type=f32) + bo_ref[l]

        h1 = layernorm(res + attn, ln1w_ref[l], ln1b_ref[l])
        f = jnp.dot(h1, w1_ref[l], preferred_element_type=f32) + b1_ref[l]
        f = jnp.maximum(f, 0.0)
        f = jnp.dot(f, w2_ref[l], preferred_element_type=f32) + b2_ref[l]
        return layernorm(h1 + f, ln2w_ref[l], ln2b_ref[l])

    # Input projection (sqrt(d_model) folded into w_in/b_in) + positional
    # encoding (alpha/beta folded into pe).  Dropout = identity.
    x_rows = x_ref[...].reshape(bb * S, IN)
    h = jnp.dot(x_rows, w_in_ref[...], preferred_element_type=f32) + b_in_ref[...]
    h = (h.reshape(bb, S, D) + pe_ref[...]).reshape(bb * S, D)

    # TODO(synk): switch to lax.fori_loop with dynamic weight-ref indexing if
    # num_layers grows beyond ~4 (static unroll bloats live ranges).
    for l in range(L - 1):
        h = encoder_layer(h, l, last_only=False)
    h_last = encoder_layer(h, L - 1, last_only=True)           # (bb, D)

    logits = (jnp.dot(h_last, w_out_ref[...], preferred_element_type=f32)
              + b_out_ref[...])                                # (bb, Cpad)
    o_ref[...] = logits.reshape(bb, 1, -1)


_WEIGHT_KEYS = ('w_in', 'b_in', 'wqkv', 'bqkv', 'wo', 'bo',
                'ln1w', 'ln1b', 'w1', 'b1', 'w2', 'b2',
                'ln2w', 'ln2b', 'w_out', 'b_out')


def _default_num_blocks(batch):
    """2 blocks on v7x (2 TensorCores/chip), else 1 (whole batch per step)."""
    try:
        kind = jax.devices()[0].device_kind.lower()
    except Exception:
        kind = ""
    if "v7" in kind and batch >= 2 and batch % 2 == 0:
        return 2
    return 1


def transformer_forward(x, packed, nhead, num_blocks=None):
    B, S, IN = x.shape
    Cp = packed['w_out'].shape[1]
    C = packed['num_classes']
    pe = packed['pe'][:S]                                      # (S, D), folded

    if num_blocks is None:
        num_blocks = _default_num_blocks(B)
    if B % num_blocks != 0:
        num_blocks = 1
    bb = B // num_blocks

    weights = [packed[k] for k in _WEIGHT_KEYS]
    vmem = pl.BlockSpec(memory_space=pltpu.MemorySpace.VMEM)
    kernel = functools.partial(_transformer_kernel, nhead=nhead)

    out = pl.pallas_call(
        kernel,
        out_shape=jax.ShapeDtypeStruct((B, 1, Cp), jnp.float32),
        grid=(num_blocks,),
        in_specs=[pl.BlockSpec((bb, S, IN), lambda g: (g, 0, 0)), vmem]
                 + [vmem] * len(weights),
        out_specs=pl.BlockSpec((bb, 1, Cp), lambda g: (g, 0, 0)),
        compiler_params=pltpu.CompilerParams(
            dimension_semantics=("parallel",),
            vmem_limit_bytes=32 * 1024 * 1024),
    )(x, pe, *weights)
    return out.reshape(B, Cp)[:, :C]


def make_params(key, input_size, d_model, nhead, num_layers, dim_ff,
                num_classes, max_len=64):
    """Random parameters in PyTorch layout (weights are [out, in])."""
    assert d_model % nhead == 0
    ks = jax.random.split(key, 4 + 8 * num_layers)

    def nrm(k, shape, scale=0.1):
        return (scale * jax.random.normal(k, shape)).astype(jnp.float32)

    p = {
        'input_proj_w': nrm(ks[0], (d_model, input_size)),
        'input_proj_b': nrm(ks[1], (d_model,)),
        'output_proj_w': nrm(ks[2], (num_classes, d_model)),
        'output_proj_b': nrm(ks[3], (num_classes,)),
        'alpha': jnp.ones((1,), jnp.float32),
        'beta': jnp.zeros((1,), jnp.float32),
        'layers': [],
    }
    for l in range(num_layers):
        kl = ks[4 + 8 * l: 4 + 8 * (l + 1)]
        p['layers'].append({
            'in_proj_w': nrm(kl[0], (3 * d_model, d_model)),
            'in_proj_b': nrm(kl[1], (3 * d_model,)),
            'out_proj_w': nrm(kl[2], (d_model, d_model)),
            'out_proj_b': nrm(kl[3], (d_model,)),
            'lin1_w': nrm(kl[4], (dim_ff, d_model)),
            'lin1_b': nrm(kl[5], (dim_ff,)),
            'lin2_w': nrm(kl[6], (d_model, dim_ff)),
            'lin2_b': nrm(kl[7], (d_model,)),
            'ln1_w': jnp.ones((d_model,), jnp.float32),
            'ln1_b': jnp.zeros((d_model,), jnp.float32),
            'ln2_w': jnp.ones((d_model,), jnp.float32),
            'ln2_b': jnp.zeros((d_model,), jnp.float32),
        })
    # Sinusoidal PE buffer, same construction as EnhancedPositionalEncoding.
    position = jnp.arange(max_len, dtype=jnp.float32)[:, None]
    div_term = jnp.exp(jnp.arange(0, d_model, 2, dtype=jnp.float32)
                       * (-math.log(10000.0) / d_model))
    pe = jnp.zeros((max_len, d_model), jnp.float32)
    pe = pe.at[:, 0::2].set(jnp.sin(position * div_term))
    pe = pe.at[:, 1::2].set(jnp.cos(position * div_term))
    p['pe'] = pe
    return p


def pack_params(p, nhead):
    """One-time host-side packing: transposes to [in, out], fused QKV weight,
    constant folds (sqrt(d_model), alpha/beta, 1/sqrt(head_dim)), lane-padded
    output head.  Everything stays f32."""
    D = p['input_proj_w'].shape[0]
    hd = D // nhead
    C = p['output_proj_w'].shape[0]
    Cp = max(128, ((C + 127) // 128) * 128)
    sqrt_d = math.sqrt(D)
    qscale = 1.0 / math.sqrt(hd)

    def stack(fn):
        return jnp.stack([fn(lp) for lp in p['layers']])

    def wqkv(lp):
        w = lp['in_proj_w'].T                      # (D, 3D), cols = [q | k | v]
        return jnp.concatenate([w[:, :D] * qscale, w[:, D:]], axis=1)

    def bqkv(lp):
        b = lp['in_proj_b']
        return jnp.concatenate([b[:D] * qscale, b[D:]]).reshape(1, 3 * D)

    w_out = jnp.zeros((D, Cp), jnp.float32).at[:, :C].set(p['output_proj_w'].T)
    b_out = jnp.zeros((1, Cp), jnp.float32).at[:, :C].set(p['output_proj_b'])

    return {
        'num_classes': C,
        # input projection with sqrt(d_model) folded in; layout [in, out]
        'w_in': p['input_proj_w'].T * sqrt_d,
        'b_in': (p['input_proj_b'] * sqrt_d).reshape(1, -1),
        # positional encoding with alpha/beta folded in
        'pe': p['alpha'][0] * p['pe'] + p['beta'][0],
        # fused QKV projection (L, D, 3D); Q columns carry 1/sqrt(head_dim)
        'wqkv': stack(wqkv),
        'bqkv': stack(bqkv),
        # attention output projection, layout [in, out]
        'wo': stack(lambda lp: lp['out_proj_w'].T),
        'bo': stack(lambda lp: lp['out_proj_b'].reshape(1, -1)),
        # feed-forward, layout [in, out]
        'w1': stack(lambda lp: lp['lin1_w'].T),
        'b1': stack(lambda lp: lp['lin1_b'].reshape(1, -1)),
        'w2': stack(lambda lp: lp['lin2_w'].T),
        'b2': stack(lambda lp: lp['lin2_b'].reshape(1, -1)),
        'ln1w': stack(lambda lp: lp['ln1_w'].reshape(1, -1)),
        'ln1b': stack(lambda lp: lp['ln1_b'].reshape(1, -1)),
        'ln2w': stack(lambda lp: lp['ln2_w'].reshape(1, -1)),
        'ln2b': stack(lambda lp: lp['ln2_b'].reshape(1, -1)),
        # output head padded to a lane-dense 128-wide store
        'w_out': w_out,
        'b_out': b_out,
    }


if __name__ == "__main__":
    # TransformerModel(input_size=16, d_model=32, nhead=4, num_layers=2,
    #                  dim_feedforward=64, num_classes=3)
    B, S = 2, 8
    input_size, d_model, nhead = 16, 32, 4
    num_layers, dim_ff, num_classes = 2, 64, 3

    key = jax.random.PRNGKey(0)
    kx, kp = jax.random.split(key)
    x = jax.random.normal(kx, (B, S, input_size), dtype=jnp.float32)

    params = make_params(kp, input_size, d_model, nhead, num_layers,
                         dim_ff, num_classes)
    packed = pack_params(params, nhead)

    out = jax.block_until_ready(transformer_forward(x, packed, nhead))
    assert out.shape == (B, num_classes)
    assert bool(jnp.all(jnp.isfinite(out)))
    print("KERNEL_OK")
</pallas_src>

<mosaic_0001>
module attributes {stable_mosaic.version = 11 : i64} {
  func.func @_transformer_kernel(%arg0: i32, %arg1: memref<2x8x16xf32, #tpu.memory_space<vmem>>, %arg2: memref<8x32xf32, #tpu.memory_space<vmem>>, %arg3: memref<16x32xf32, #tpu.memory_space<vmem>>, %arg4: memref<1x32xf32, #tpu.memory_space<vmem>>, %arg5: memref<2x32x96xf32, #tpu.memory_space<vmem>>, %arg6: memref<2x1x96xf32, #tpu.memory_space<vmem>>, %arg7: memref<2x32x32xf32, #tpu.memory_space<vmem>>, %arg8: memref<2x1x32xf32, #tpu.memory_space<vmem>>, %arg9: memref<2x1x32xf32, #tpu.memory_space<vmem>>, %arg10: memref<2x1x32xf32, #tpu.memory_space<vmem>>, %arg11: memref<2x32x64xf32, #tpu.memory_space<vmem>>, %arg12: memref<2x1x64xf32, #tpu.memory_space<vmem>>, %arg13: memref<2x64x32xf32, #tpu.memory_space<vmem>>, %arg14: memref<2x1x32xf32, #tpu.memory_space<vmem>>, %arg15: memref<2x1x32xf32, #tpu.memory_space<vmem>>, %arg16: memref<2x1x32xf32, #tpu.memory_space<vmem>>, %arg17: memref<32x128xf32, #tpu.memory_space<vmem>>, %arg18: memref<1x128xf32, #tpu.memory_space<vmem>>, %arg19: memref<2x1x128xf32, #tpu.memory_space<vmem>>) attributes {dimension_semantics = [#tpu.dimension_semantics<parallel>], iteration_bounds = array<i64: 1>, scalar_prefetch = 0 : i64, scratch_operands = 0 : i64, tpu.core_type = #tpu.core_type<tc>, window_params = [{transform_indices = @transform_0, window_bounds = array<i64: 2, 8, 16>}, {pipeline_mode = #tpu.pipeline_mode<synchronous>, transform_indices = @transform_1, window_bounds = array<i64: 8, 32>}, {pipeline_mode = #tpu.pipeline_mode<synchronous>, transform_indices = @transform_2, window_bounds = array<i64: 16, 32>}, {pipeline_mode = #tpu.pipeline_mode<synchronous>, transform_indices = @transform_3, window_bounds = array<i64: 1, 32>}, {pipeline_mode = #tpu.pipeline_mode<synchronous>, transform_indices = @transform_4, window_bounds = array<i64: 2, 32, 96>}, {pipeline_mode = #tpu.pipeline_mode<synchronous>, transform_indices = @transform_5, window_bounds = array<i64: 2, 1, 96>}, {pipeline_mode = #tpu.pipeline_mode<synchronous>, transform_indices = @transform_6, window_bounds = array<i64: 2, 32, 32>}, {pipeline_mode = #tpu.pipeline_mode<synchronous>, transform_indices = @transform_7, window_bounds = array<i64: 2, 1, 32>}, {pipeline_mode = #tpu.pipeline_mode<synchronous>, transform_indices = @transform_8, window_bounds = array<i64: 2, 1, 32>}, {pipeline_mode = #tpu.pipeline_mode<synchronous>, transform_indices = @transform_9, window_bounds = array<i64: 2, 1, 32>}, {pipeline_mode = #tpu.pipeline_mode<synchronous>, transform_indices = @transform_10, window_bounds = array<i64: 2, 32, 64>}, {pipeline_mode = #tpu.pipeline_mode<synchronous>, transform_indices = @transform_11, window_bounds = array<i64: 2, 1, 64>}, {pipeline_mode = #tpu.pipeline_mode<synchronous>, transform_indices = @transform_12, window_bounds = array<i64: 2, 64, 32>}, {pipeline_mode = #tpu.pipeline_mode<synchronous>, transform_indices = @transform_13, window_bounds = array<i64: 2, 1, 32>}, {pipeline_mode = #tpu.pipeline_mode<synchronous>, transform_indices = @transform_14, window_bounds = array<i64: 2, 1, 32>}, {pipeline_mode = #tpu.pipeline_mode<synchronous>, transform_indices = @transform_15, window_bounds = array<i64: 2, 1, 32>}, {pipeline_mode = #tpu.pipeline_mode<synchronous>, transform_indices = @transform_16, window_bounds = array<i64: 32, 128>}, {pipeline_mode = #tpu.pipeline_mode<synchronous>, transform_indices = @transform_17, window_bounds = array<i64: 1, 128>}, {transform_indices = @transform_18, window_bounds = array<i64: 2, 1, 128>}]} {
    %c0 = arith.constant 0 : index
    %c0_0 = arith.constant 0 : index
    %c0_1 = arith.constant 0 : index
    %0 = vector.load %arg1[%c0, %c0_0, %c0_1] : memref<2x8x16xf32, #tpu.memory_space<vmem>>, vector<2x8x16xf32>
    %1 = vector.shape_cast %0 : vector<2x8x16xf32> to vector<16x16xf32>
    %c0_2 = arith.constant 0 : index
    %c0_3 = arith.constant 0 : index
    %2 = vector.load %arg3[%c0_2, %c0_3] : memref<16x32xf32, #tpu.memory_space<vmem>>, vector<16x32xf32>
    %cst = arith.constant dense<0.000000e+00> : vector<16x32xf32>
    %3 = tpu.matmul %1, %2, %cst {dimension_numbers = #tpu.dot_dimension_numbers<[1], [0], [0], [1], [0, 0, 1, 1], [], []>} : vector<16x16xf32>, vector<16x32xf32>, vector<16x32xf32> -> vector<16x32xf32>
    %c0_4 = arith.constant 0 : index
    %c0_5 = arith.constant 0 : index
    %4 = vector.load %arg4[%c0_4, %c0_5] : memref<1x32xf32, #tpu.memory_space<vmem>>, vector<1x32xf32>
    %5 = vector.broadcast %4 : vector<1x32xf32> to vector<16x32xf32>
    %6 = arith.addf %3, %5 : vector<16x32xf32>
    %7 = vector.shape_cast %6 : vector<16x32xf32> to vector<2x8x32xf32>
    %c0_6 = arith.constant 0 : index
    %c0_7 = arith.constant 0 : index
    %8 = vector.load %arg2[%c0_6, %c0_7] : memref<8x32xf32, #tpu.memory_space<vmem>>, vector<8x32xf32>
    %9 = vector.shape_cast %8 : vector<8x32xf32> to vector<1x8x32xf32>
    %10 = vector.broadcast %9 : vector<1x8x32xf32> to vector<2x8x32xf32>
    %11 = arith.addf %7, %10 : vector<2x8x32xf32>
    %12 = vector.shape_cast %11 : vector<2x8x32xf32> to vector<16x32xf32>
    %c0_8 = arith.constant 0 : index
    %c0_9 = arith.constant 0 : index
    %c0_10 = arith.constant 0 : index
    %13 = vector.load %arg5[%c0_8, %c0_9, %c0_10] : memref<2x32x96xf32, #tpu.memory_space<vmem>>, vector<1x32x96xf32>
    %14 = vector.shape_cast %13 : vector<1x32x96xf32> to vector<32x96xf32>
    %cst_11 = arith.constant dense<0.000000e+00> : vector<16x96xf32>
    %15 = tpu.matmul %12, %14, %cst_11 {dimension_numbers = #tpu.dot_dimension_numbers<[1], [0], [0], [1], [0, 0, 1, 1], [], []>} : vector<16x32xf32>, vector<32x96xf32>, vector<16x96xf32> -> vector<16x96xf32>
    %c0_12 = arith.constant 0 : index
    %c0_13 = arith.constant 0 : index
    %c0_14 = arith.constant 0 : index
    %16 = vector.load %arg6[%c0_12, %c0_13, %c0_14] : memref<2x1x96xf32, #tpu.memory_space<vmem>>, vector<1x1x96xf32>
    %17 = vector.shape_cast %16 : vector<1x1x96xf32> to vector<1x96xf32>
    %18 = vector.broadcast %17 : vector<1x96xf32> to vector<16x96xf32>
    %19 = arith.addf %15, %18 : vector<16x96xf32>
    %20 = vector.shape_cast %19 : vector<16x96xf32> to vector<2x8x96xf32>
    %21 = vector.extract_strided_slice %20 {offsets = [0, 0, 0], sizes = [2, 8, 32], strides = [1, 1, 1]} : vector<2x8x96xf32> to vector<2x8x32xf32>
    %22 = vector.extract_strided_slice %20 {offsets = [0, 0, 32], sizes = [2, 8, 32], strides = [1, 1, 1]} : vector<2x8x96xf32> to vector<2x8x32xf32>
    %23 = vector.extract_strided_slice %20 {offsets = [0, 0, 64], sizes = [2, 8, 32], strides = [1, 1, 1]} : vector<2x8x96xf32> to vector<2x8x32xf32>
    %24 = vector.extract_strided_slice %21 {offsets = [0, 0, 0], sizes = [2, 8, 8], strides = [1, 1, 1]} : vector<2x8x32xf32> to vector<2x8x8xf32>
    %25 = vector.extract_strided_slice %22 {offsets = [0, 0, 0], sizes = [2, 8, 8], strides = [1, 1, 1]} : vector<2x8x32xf32> to vector<2x8x8xf32>
    "tpu.trace_start"() <{level = 10 : i32, message = "bqd,bkd->bqk"}> : () -> ()
    %cst_15 = arith.constant dense<0.000000e+00> : vector<2x8x8xf32>
    %26 = tpu.matmul %24, %25, %cst_15 {dimension_numbers = #tpu.dot_dimension_numbers<[2], [2], [1], [1], [0, 0, 0, 1, 1, 1], [0], [0]>} : vector<2x8x8xf32>, vector<2x8x8xf32>, vector<2x8x8xf32> -> vector<2x8x8xf32>
    "tpu.trace_stop"() : () -> ()
    %cst_16 = arith.constant dense<0xFF800000> : vector<2x8xf32>
    %27 = vector.multi_reduction <maximumf>, %26, %cst_16 [2] : vector<2x8x8xf32> to vector<2x8xf32>
    %28 = vector.shape_cast %27 : vector<2x8xf32> to vector<2x8x1xf32>
    %29 = vector.broadcast %28 : vector<2x8x1xf32> to vector<2x8x8xf32>
    %30 = arith.subf %26, %29 : vector<2x8x8xf32>
    %31 = math.exp %30 : vector<2x8x8xf32>
    %cst_17 = arith.constant dense<0.000000e+00> : vector<2x8xf32>
    %32 = vector.multi_reduction <add>, %31, %cst_17 [2] : vector<2x8x8xf32> to vector<2x8xf32>
    %33 = vector.shape_cast %32 : vector<2x8xf32> to vector<2x8x1xf32>
    %34 = vector.broadcast %33 : vector<2x8x1xf32> to vector<2x8x8xf32>
    %35 = arith.divf %31, %34 : vector<2x8x8xf32>
    %36 = vector.extract_strided_slice %23 {offsets = [0, 0, 0], sizes = [2, 8, 8], strides = [1, 1, 1]} : vector<2x8x32xf32> to vector<2x8x8xf32>
    "tpu.trace_start"() <{level = 10 : i32, message = "bqk,bkd->bqd"}> : () -> ()
    %cst_18 = arith.constant dense<0.000000e+00> : vector<2x8x8xf32>
    %37 = tpu.matmul %35, %36, %cst_18 {dimension_numbers = #tpu.dot_dimension_numbers<[2], [1], [1], [2], [0, 0, 0, 1, 1, 2], [0], [0]>} : vector<2x8x8xf32>, vector<2x8x8xf32>, vector<2x8x8xf32> -> vector<2x8x8xf32>
    "tpu.trace_stop"() : () -> ()
    %38 = vector.extract_strided_slice %21 {offsets = [0, 0, 8], sizes = [2, 8, 8], strides = [1, 1, 1]} : vector<2x8x32xf32> to vector<2x8x8xf32>
    %39 = vector.extract_strided_slice %22 {offsets = [0, 0, 8], sizes = [2, 8, 8], strides = [1, 1, 1]} : vector<2x8x32xf32> to vector<2x8x8xf32>
    "tpu.trace_start"() <{level = 10 : i32, message = "bqd,bkd->bqk"}> : () -> ()
    %cst_19 = arith.constant dense<0.000000e+00> : vector<2x8x8xf32>
    %40 = tpu.matmul %38, %39, %cst_19 {dimension_numbers = #tpu.dot_dimension_numbers<[2], [2], [1], [1], [0, 0, 0, 1, 1, 1], [0], [0]>} : vector<2x8x8xf32>, vector<2x8x8xf32>, vector<2x8x8xf32> -> vector<2x8x8xf32>
    "tpu.trace_stop"() : () -> ()
    %cst_20 = arith.constant dense<0xFF800000> : vector<2x8xf32>
    %41 = vector.multi_reduction <maximumf>, %40, %cst_20 [2] : vector<2x8x8xf32> to vector<2x8xf32>
    %42 = vector.shape_cast %41 : vector<2x8xf32> to vector<2x8x1xf32>
    %43 = vector.broadcast %42 : vector<2x8x1xf32> to vector<2x8x8xf32>
    %44 = arith.subf %40, %43 : vector<2x8x8xf32>
    %45 = math.exp %44 : vector<2x8x8xf32>
    %cst_21 = arith.constant dense<0.000000e+00> : vector<2x8xf32>
    %46 = vector.multi_reduction <add>, %45, %cst_21 [2] : vector<2x8x8xf32> to vector<2x8xf32>
    %47 = vector.shape_cast %46 : vector<2x8xf32> to vector<2x8x1xf32>
    %48 = vector.broadcast %47 : vector<2x8x1xf32> to vector<2x8x8xf32>
    %49 = arith.divf %45, %48 : vector<2x8x8xf32>
    %50 = vector.extract_strided_slice %23 {offsets = [0, 0, 8], sizes = [2, 8, 8], strides = [1, 1, 1]} : vector<2x8x32xf32> to vector<2x8x8xf32>
    "tpu.trace_start"() <{level = 10 : i32, message = "bqk,bkd->bqd"}> : () -> ()
    %cst_22 = arith.constant dense<0.000000e+00> : vector<2x8x8xf32>
    %51 = tpu.matmul %49, %50, %cst_22 {dimension_numbers = #tpu.dot_dimension_numbers<[2], [1], [1], [2], [0, 0, 0, 1, 1, 2], [0], [0]>} : vector<2x8x8xf32>, vector<2x8x8xf32>, vector<2x8x8xf32> -> vector<2x8x8xf32>
    "tpu.trace_stop"() : () -> ()
    %52 = vector.extract_strided_slice %21 {offsets = [0, 0, 16], sizes = [2, 8, 8], strides = [1, 1, 1]} : vector<2x8x32xf32> to vector<2x8x8xf32>
    %53 = vector.extract_strided_slice %22 {offsets = [0, 0, 16], sizes = [2, 8, 8], strides = [1, 1, 1]} : vector<2x8x32xf32> to vector<2x8x8xf32>
    "tpu.trace_start"() <{level = 10 : i32, message = "bqd,bkd->bqk"}> : () -> ()
    %cst_23 = arith.constant dense<0.000000e+00> : vector<2x8x8xf32>
    %54 = tpu.matmul %52, %53, %cst_23 {dimension_numbers = #tpu.dot_dimension_numbers<[2], [2], [1], [1], [0, 0, 0, 1, 1, 1], [0], [0]>} : vector<2x8x8xf32>, vector<2x8x8xf32>, vector<2x8x8xf32> -> vector<2x8x8xf32>
    "tpu.trace_stop"() : () -> ()
    %cst_24 = arith.constant dense<0xFF800000> : vector<2x8xf32>
    %55 = vector.multi_reduction <maximumf>, %54, %cst_24 [2] : vector<2x8x8xf32> to vector<2x8xf32>
    %56 = vector.shape_cast %55 : vector<2x8xf32> to vector<2x8x1xf32>
    %57 = vector.broadcast %56 : vector<2x8x1xf32> to vector<2x8x8xf32>
    %58 = arith.subf %54, %57 : vector<2x8x8xf32>
    %59 = math.exp %58 : vector<2x8x8xf32>
    %cst_25 = arith.constant dense<0.000000e+00> : vector<2x8xf32>
    %60 = vector.multi_reduction <add>, %59, %cst_25 [2] : vector<2x8x8xf32> to vector<2x8xf32>
    %61 = vector.shape_cast %60 : vector<2x8xf32> to vector<2x8x1xf32>
    %62 = vector.broadcast %61 : vector<2x8x1xf32> to vector<2x8x8xf32>
    %63 = arith.divf %59, %62 : vector<2x8x8xf32>
    %64 = vector.extract_strided_slice %23 {offsets = [0, 0, 16], sizes = [2, 8, 8], strides = [1, 1, 1]} : vector<2x8x32xf32> to vector<2x8x8xf32>
    "tpu.trace_start"() <{level = 10 : i32, message = "bqk,bkd->bqd"}> : () -> ()
    %cst_26 = arith.constant dense<0.000000e+00> : vector<2x8x8xf32>
    %65 = tpu.matmul %63, %64, %cst_26 {dimension_numbers = #tpu.dot_dimension_numbers<[2], [1], [1], [2], [0, 0, 0, 1, 1, 2], [0], [0]>} : vector<2x8x8xf32>, vector<2x8x8xf32>, vector<2x8x8xf32> -> vector<2x8x8xf32>
    "tpu.trace_stop"() : () -> ()
    %66 = vector.extract_strided_slice %21 {offsets = [0, 0, 24], sizes = [2, 8, 8], strides = [1, 1, 1]} : vector<2x8x32xf32> to vector<2x8x8xf32>
    %67 = vector.extract_strided_slice %22 {offsets = [0, 0, 24], sizes = [2, 8, 8], strides = [1, 1, 1]} : vector<2x8x32xf32> to vector<2x8x8xf32>
    "tpu.trace_start"() <{level = 10 : i32, message = "bqd,bkd->bqk"}> : () -> ()
    %cst_27 = arith.constant dense<0.000000e+00> : vector<2x8x8xf32>
    %68 = tpu.matmul %66, %67, %cst_27 {dimension_numbers = #tpu.dot_dimension_numbers<[2], [2], [1], [1], [0, 0, 0, 1, 1, 1], [0], [0]>} : vector<2x8x8xf32>, vector<2x8x8xf32>, vector<2x8x8xf32> -> vector<2x8x8xf32>
    "tpu.trace_stop"() : () -> ()
    %cst_28 = arith.constant dense<0xFF800000> : vector<2x8xf32>
    %69 = vector.multi_reduction <maximumf>, %68, %cst_28 [2] : vector<2x8x8xf32> to vector<2x8xf32>
    %70 = vector.shape_cast %69 : vector<2x8xf32> to vector<2x8x1xf32>
    %71 = vector.broadcast %70 : vector<2x8x1xf32> to vector<2x8x8xf32>
    %72 = arith.subf %68, %71 : vector<2x8x8xf32>
    %73 = math.exp %72 : vector<2x8x8xf32>
    %cst_29 = arith.constant dense<0.000000e+00> : vector<2x8xf32>
    %74 = vector.multi_reduction <add>, %73, %cst_29 [2] : vector<2x8x8xf32> to vector<2x8xf32>
    %75 = vector.shape_cast %74 : vector<2x8xf32> to vector<2x8x1xf32>
    %76 = vector.broadcast %75 : vector<2x8x1xf32> to vector<2x8x8xf32>
    %77 = arith.divf %73, %76 : vector<2x8x8xf32>
    %78 = vector.extract_strided_slice %23 {offsets = [0, 0, 24], sizes = [2, 8, 8], strides = [1, 1, 1]} : vector<2x8x32xf32> to vector<2x8x8xf32>
    "tpu.trace_start"() <{level = 10 : i32, message = "bqk,bkd->bqd"}> : () -> ()
    %cst_30 = arith.constant dense<0.000000e+00> : vector<2x8x8xf32>
    %79 = tpu.matmul %77, %78, %cst_30 {dimension_numbers = #tpu.dot_dimension_numbers<[2], [1], [1], [2], [0, 0, 0, 1, 1, 2], [0], [0]>} : vector<2x8x8xf32>, vector<2x8x8xf32>, vector<2x8x8xf32> -> vector<2x8x8xf32>
    "tpu.trace_stop"() : () -> ()
    %80 = tpu.concatenate %37, %51, %65, %79 in 2 : vector<2x8x8xf32>, vector<2x8x8xf32>, vector<2x8x8xf32>, vector<2x8x8xf32> -> vector<2x8x32xf32>
    %81 = vector.shape_cast %80 : vector<2x8x32xf32> to vector<16x32xf32>
    %c0_31 = arith.constant 0 : index
    %c0_32 = arith.constant 0 : index
    %c0_33 = arith.constant 0 : index
    %82 = vector.load %arg7[%c0_31, %c0_32, %c0_33] : memref<2x32x32xf32, #tpu.memory_space<vmem>>, vector<1x32x32xf32>
    %83 = vector.shape_cast %82 : vector<1x32x32xf32> to vector<32x32xf32>
    %cst_34 = arith.constant dense<0.000000e+00> : vector<16x32xf32>
    %84 = tpu.matmul %81, %83, %cst_34 {dimension_numbers = #tpu.dot_dimension_numbers<[1], [0], [0], [1], [0, 0, 1, 1], [], []>} : vector<16x32xf32>, vector<32x32xf32>, vector<16x32xf32> -> vector<16x32xf32>
    %c0_35 = arith.constant 0 : index
    %c0_36 = arith.constant 0 : index
    %c0_37 = arith.constant 0 : index
    %85 = vector.load %arg8[%c0_35, %c0_36, %c0_37] : memref<2x1x32xf32, #tpu.memory_space<vmem>>, vector<1x1x32xf32>
    %86 = vector.shape_cast %85 : vector<1x1x32xf32> to vector<1x32xf32>
    %87 = vector.broadcast %86 : vector<1x32xf32> to vector<16x32xf32>
    %88 = arith.addf %84, %87 : vector<16x32xf32>
    %89 = arith.addf %12, %88 : vector<16x32xf32>
    %c0_38 = arith.constant 0 : index
    %c0_39 = arith.constant 0 : index
    %c0_40 = arith.constant 0 : index
    %90 = vector.load %arg9[%c0_38, %c0_39, %c0_40] : memref<2x1x32xf32, #tpu.memory_space<vmem>>, vector<1x1x32xf32>
    %91 = vector.shape_cast %90 : vector<1x1x32xf32> to vector<1x32xf32>
    %c0_41 = arith.constant 0 : index
    %c0_42 = arith.constant 0 : index
    %c0_43 = arith.constant 0 : index
    %92 = vector.load %arg10[%c0_41, %c0_42, %c0_43] : memref<2x1x32xf32, #tpu.memory_space<vmem>>, vector<1x1x32xf32>
    %93 = vector.shape_cast %92 : vector<1x1x32xf32> to vector<1x32xf32>
    %cst_44 = arith.constant dense<0.000000e+00> : vector<16xf32>
    %94 = vector.multi_reduction <add>, %89, %cst_44 [1] : vector<16x32xf32> to vector<16xf32>
    %95 = vector.shape_cast %94 : vector<16xf32> to vector<16x1xf32>
    %cst_45 = arith.constant 3.200000e+01 : f32
    %96 = vector.broadcast %cst_45 : f32 to vector<16x1xf32>
    %97 = arith.divf %95, %96 : vector<16x1xf32>
    %98 = vector.broadcast %97 : vector<16x1xf32> to vector<16x32xf32>
    %99 = arith.subf %89, %98 : vector<16x32xf32>
    %100 = arith.mulf %99, %99 : vector<16x32xf32>
    %cst_46 = arith.constant dense<0.000000e+00> : vector<16xf32>
    %101 = vector.multi_reduction <add>, %100, %cst_46 [1] : vector<16x32xf32> to vector<16xf32>
    %102 = vector.shape_cast %101 : vector<16xf32> to vector<16x1xf32>
    %cst_47 = arith.constant 3.200000e+01 : f32
    %103 = vector.broadcast %cst_47 : f32 to vector<16x1xf32>
    %104 = arith.divf %102, %103 : vector<16x1xf32>
    %105 = vector.broadcast %97 : vector<16x1xf32> to vector<16x32xf32>
    %106 = arith.subf %89, %105 : vector<16x32xf32>
    %cst_48 = arith.constant 9.99999974E-6 : f32
    %107 = vector.broadcast %cst_48 : f32 to vector<16x1xf32>
    %108 = arith.addf %104, %107 : vector<16x1xf32>
    %109 = math.rsqrt %108 : vector<16x1xf32>
    %110 = vector.broadcast %109 : vector<16x1xf32> to vector<16x32xf32>
    %111 = arith.mulf %106, %110 : vector<16x32xf32>
    %112 = vector.broadcast %91 : vector<1x32xf32> to vector<16x32xf32>
    %113 = arith.mulf %111, %112 : vector<16x32xf32>
    %114 = vector.broadcast %93 : vector<1x32xf32> to vector<16x32xf32>
    %115 = arith.addf %113, %114 : vector<16x32xf32>
    %c0_49 = arith.constant 0 : index
    %c0_50 = arith.constant 0 : index
    %c0_51 = arith.constant 0 : index
    %116 = vector.load %arg11[%c0_49, %c0_50, %c0_51] : memref<2x32x64xf32, #tpu.memory_space<vmem>>, vector<1x32x64xf32>
    %117 = vector.shape_cast %116 : vector<1x32x64xf32> to vector<32x64xf32>
    %cst_52 = arith.constant dense<0.000000e+00> : vector<16x64xf32>
    %118 = tpu.matmul %115, %117, %cst_52 {dimension_numbers = #tpu.dot_dimension_numbers<[1], [0], [0], [1], [0, 0, 1, 1], [], []>} : vector<16x32xf32>, vector<32x64xf32>, vector<16x64xf32> -> vector<16x64xf32>
    %c0_53 = arith.constant 0 : index
    %c0_54 = arith.constant 0 : index
    %c0_55 = arith.constant 0 : index
    %119 = vector.load %arg12[%c0_53, %c0_54, %c0_55] : memref<2x1x64xf32, #tpu.memory_space<vmem>>, vector<1x1x64xf32>
    %120 = vector.shape_cast %119 : vector<1x1x64xf32> to vector<1x64xf32>
    %121 = vector.broadcast %120 : vector<1x64xf32> to vector<16x64xf32>
    %122 = arith.addf %118, %121 : vector<16x64xf32>
    %cst_56 = arith.constant 0.000000e+00 : f32
    %123 = vector.broadcast %cst_56 : f32 to vector<16x64xf32>
    %124 = arith.maximumf %122, %123 : vector<16x64xf32>
    %c0_57 = arith.constant 0 : index
    %c0_58 = arith.constant 0 : index
    %c0_59 = arith.constant 0 : index
    %125 = vector.load %arg13[%c0_57, %c0_58, %c0_59] : memref<2x64x32xf32, #tpu.memory_space<vmem>>, vector<1x64x32xf32>
    %126 = vector.shape_cast %125 : vector<1x64x32xf32> to vector<64x32xf32>
    %cst_60 = arith.constant dense<0.000000e+00> : vector<16x32xf32>
    %127 = tpu.matmul %124, %126, %cst_60 {dimension_numbers = #tpu.dot_dimension_numbers<[1], [0], [0], [1], [0, 0, 1, 1], [], []>} : vector<16x64xf32>, vector<64x32xf32>, vector<16x32xf32> -> vector<16x32xf32>
    %c0_61 = arith.constant 0 : index
    %c0_62 = arith.constant 0 : index
    %c0_63 = arith.constant 0 : index
    %128 = vector.load %arg14[%c0_61, %c0_62, %c0_63] : memref<2x1x32xf32, #tpu.memory_space<vmem>>, vector<1x1x32xf32>
    %129 = vector.shape_cast %128 : vector<1x1x32xf32> to vector<1x32xf32>
    %130 = vector.broadcast %129 : vector<1x32xf32> to vector<16x32xf32>
    %131 = arith.addf %127, %130 : vector<16x32xf32>
    %132 = arith.addf %115, %131 : vector<16x32xf32>
    %c0_64 = arith.constant 0 : index
    %c0_65 = arith.constant 0 : index
    %c0_66 = arith.constant 0 : index
    %133 = vector.load %arg15[%c0_64, %c0_65, %c0_66] : memref<2x1x32xf32, #tpu.memory_space<vmem>>, vector<1x1x32xf32>
    %134 = vector.shape_cast %133 : vector<1x1x32xf32> to vector<1x32xf32>
    %c0_67 = arith.constant 0 : index
    %c0_68 = arith.constant 0 : index
    %c0_69 = arith.constant 0 : index
    %135 = vector.load %arg16[%c0_67, %c0_68, %c0_69] : memref<2x1x32xf32, #tpu.memory_space<vmem>>, vector<1x1x32xf32>
    %136 = vector.shape_cast %135 : vector<1x1x32xf32> to vector<1x32xf32>
    %cst_70 = arith.constant dense<0.000000e+00> : vector<16xf32>
    %137 = vector.multi_reduction <add>, %132, %cst_70 [1] : vector<16x32xf32> to vector<16xf32>
    %138 = vector.shape_cast %137 : vector<16xf32> to vector<16x1xf32>
    %cst_71 = arith.constant 3.200000e+01 : f32
    %139 = vector.broadcast %cst_71 : f32 to vector<16x1xf32>
    %140 = arith.divf %138, %139 : vector<16x1xf32>
    %141 = vector.broadcast %140 : vector<16x1xf32> to vector<16x32xf32>
    %142 = arith.subf %132, %141 : vector<16x32xf32>
    %143 = arith.mulf %142, %142 : vector<16x32xf32>
    %cst_72 = arith.constant dense<0.000000e+00> : vector<16xf32>
    %144 = vector.multi_reduction <add>, %143, %cst_72 [1] : vector<16x32xf32> to vector<16xf32>
    %145 = vector.shape_cast %144 : vector<16xf32> to vector<16x1xf32>
    %cst_73 = arith.constant 3.200000e+01 : f32
    %146 = vector.broadcast %cst_73 : f32 to vector<16x1xf32>
    %147 = arith.divf %145, %146 : vector<16x1xf32>
    %148 = vector.broadcast %140 : vector<16x1xf32> to vector<16x32xf32>
    %149 = arith.subf %132, %148 : vector<16x32xf32>
    %cst_74 = arith.constant 9.99999974E-6 : f32
    %150 = vector.broadcast %cst_74 : f32 to vector<16x1xf32>
    %151 = arith.addf %147, %150 : vector<16x1xf32>
    %152 = math.rsqrt %151 : vector<16x1xf32>
    %153 = vector.broadcast %152 : vector<16x1xf32> to vector<16x32xf32>
    %154 = arith.mulf %149, %153 : vector<16x32xf32>
    %155 = vector.broadcast %134 : vector<1x32xf32> to vector<16x32xf32>
    %156 = arith.mulf %154, %155 : vector<16x32xf32>
    %157 = vector.broadcast %136 : vector<1x32xf32> to vector<16x32xf32>
    %158 = arith.addf %156, %157 : vector<16x32xf32>
    %c1 = arith.constant 1 : index
    %c0_75 = arith.constant 0 : index
    %c0_76 = arith.constant 0 : index
    %159 = vector.load %arg5[%c1, %c0_75, %c0_76] : memref<2x32x96xf32, #tpu.memory_space<vmem>>, vector<1x32x96xf32>
    %160 = vector.shape_cast %159 : vector<1x32x96xf32> to vector<32x96xf32>
    %cst_77 = arith.constant dense<0.000000e+00> : vector<16x96xf32>
    %161 = tpu.matmul %158, %160, %cst_77 {dimension_numbers = #tpu.dot_dimension_numbers<[1], [0], [0], [1], [0, 0, 1, 1], [], []>} : vector<16x32xf32>, vector<32x96xf32>, vector<16x96xf32> -> vector<16x96xf32>
    %c1_78 = arith.constant 1 : index
    %c0_79 = arith.constant 0 : index
    %c0_80 = arith.constant 0 : index
    %162 = vector.load %arg6[%c1_78, %c0_79, %c0_80] : memref<2x1x96xf32, #tpu.memory_space<vmem>>, vector<1x1x96xf32>
    %163 = vector.shape_cast %162 : vector<1x1x96xf32> to vector<1x96xf32>
    %164 = vector.broadcast %163 : vector<1x96xf32> to vector<16x96xf32>
    %165 = arith.addf %161, %164 : vector<16x96xf32>
    %166 = vector.shape_cast %165 : vector<16x96xf32> to vector<2x8x96xf32>
    %167 = vector.extract_strided_slice %166 {offsets = [0, 0, 0], sizes = [2, 8, 32], strides = [1, 1, 1]} : vector<2x8x96xf32> to vector<2x8x32xf32>
    %168 = vector.extract_strided_slice %166 {offsets = [0, 0, 32], sizes = [2, 8, 32], strides = [1, 1, 1]} : vector<2x8x96xf32> to vector<2x8x32xf32>
    %169 = vector.extract_strided_slice %166 {offsets = [0, 0, 64], sizes = [2, 8, 32], strides = [1, 1, 1]} : vector<2x8x96xf32> to vector<2x8x32xf32>
    %170 = vector.extract_strided_slice %167 {offsets = [0, 7, 0], sizes = [2, 1, 32], strides = [1, 1, 1]} : vector<2x8x32xf32> to vector<2x1x32xf32>
    %171 = vector.shape_cast %158 : vector<16x32xf32> to vector<2x8x32xf32>
    %172 = vector.extract_strided_slice %171 {offsets = [0, 7, 0], sizes = [2, 1, 32], strides = [1, 1, 1]} : vector<2x8x32xf32> to vector<2x1x32xf32>
    %173 = vector.shape_cast %172 : vector<2x1x32xf32> to vector<2x32xf32>
    %174 = vector.extract_strided_slice %170 {offsets = [0, 0, 0], sizes = [2, 1, 8], strides = [1, 1, 1]} : vector<2x1x32xf32> to vector<2x1x8xf32>
    %175 = vector.extract_strided_slice %168 {offsets = [0, 0, 0], sizes = [2, 8, 8], strides = [1, 1, 1]} : vector<2x8x32xf32> to vector<2x8x8xf32>
    "tpu.trace_start"() <{level = 10 : i32, message = "bqd,bkd->bqk"}> : () -> ()
    %cst_81 = arith.constant dense<0.000000e+00> : vector<2x1x8xf32>
    %176 = tpu.matmul %174, %175, %cst_81 {dimension_numbers = #tpu.dot_dimension_numbers<[2], [2], [1], [1], [0, 0, 0, 1, 1, 1], [0], [0]>} : vector<2x1x8xf32>, vector<2x8x8xf32>, vector<2x1x8xf32> -> vector<2x1x8xf32>
    "tpu.trace_stop"() : () -> ()
    %cst_82 = arith.constant dense<0xFF800000> : vector<2x1xf32>
    %177 = vector.multi_reduction <maximumf>, %176, %cst_82 [2] : vector<2x1x8xf32> to vector<2x1xf32>
    %178 = vector.shape_cast %177 : vector<2x1xf32> to vector<2x1x1xf32>
    %179 = vector.broadcast %178 : vector<2x1x1xf32> to vector<2x1x8xf32>
    %180 = arith.subf %176, %179 : vector<2x1x8xf32>
    %181 = math.exp %180 : vector<2x1x8xf32>
    %cst_83 = arith.constant dense<0.000000e+00> : vector<2x1xf32>
    %182 = vector.multi_reduction <add>, %181, %cst_83 [2] : vector<2x1x8xf32> to vector<2x1xf32>
    %183 = vector.shape_cast %182 : vector<2x1xf32> to vector<2x1x1xf32>
    %184 = vector.broadcast %183 : vector<2x1x1xf32> to vector<2x1x8xf32>
    %185 = arith.divf %181, %184 : vector<2x1x8xf32>
    %186 = vector.extract_strided_slice %169 {offsets = [0, 0, 0], sizes = [2, 8, 8], strides = [1, 1, 1]} : vector<2x8x32xf32> to vector<2x8x8xf32>
    "tpu.trace_start"() <{level = 10 : i32, message = "bqk,bkd->bqd"}> : () -> ()
    %cst_84 = arith.constant dense<0.000000e+00> : vector<2x1x8xf32>
    %187 = tpu.matmul %185, %186, %cst_84 {dimension_numbers = #tpu.dot_dimension_numbers<[2], [1], [1], [2], [0, 0, 0, 1, 1, 2], [0], [0]>} : vector<2x1x8xf32>, vector<2x8x8xf32>, vector<2x1x8xf32> -> vector<2x1x8xf32>
    "tpu.trace_stop"() : () -> ()
    %188 = vector.extract_strided_slice %170 {offsets = [0, 0, 8], sizes = [2, 1, 8], strides = [1, 1, 1]} : vector<2x1x32xf32> to vector<2x1x8xf32>
    %189 = vector.extract_strided_slice %168 {offsets = [0, 0, 8], sizes = [2, 8, 8], strides = [1, 1, 1]} : vector<2x8x32xf32> to vector<2x8x8xf32>
    "tpu.trace_start"() <{level = 10 : i32, message = "bqd,bkd->bqk"}> : () -> ()
    %cst_85 = arith.constant dense<0.000000e+00> : vector<2x1x8xf32>
    %190 = tpu.matmul %188, %189, %cst_85 {dimension_numbers = #tpu.dot_dimension_numbers<[2], [2], [1], [1], [0, 0, 0, 1, 1, 1], [0], [0]>} : vector<2x1x8xf32>, vector<2x8x8xf32>, vector<2x1x8xf32> -> vector<2x1x8xf32>
    "tpu.trace_stop"() : () -> ()
    %cst_86 = arith.constant dense<0xFF800000> : vector<2x1xf32>
    %191 = vector.multi_reduction <maximumf>, %190, %cst_86 [2] : vector<2x1x8xf32> to vector<2x1xf32>
    %192 = vector.shape_cast %191 : vector<2x1xf32> to vector<2x1x1xf32>
    %193 = vector.broadcast %192 : vector<2x1x1xf32> to vector<2x1x8xf32>
    %194 = arith.subf %190, %193 : vector<2x1x8xf32>
    %195 = math.exp %194 : vector<2x1x8xf32>
    %cst_87 = arith.constant dense<0.000000e+00> : vector<2x1xf32>
    %196 = vector.multi_reduction <add>, %195, %cst_87 [2] : vector<2x1x8xf32> to vector<2x1xf32>
    %197 = vector.shape_cast %196 : vector<2x1xf32> to vector<2x1x1xf32>
    %198 = vector.broadcast %197 : vector<2x1x1xf32> to vector<2x1x8xf32>
    %199 = arith.divf %195, %198 : vector<2x1x8xf32>
    %200 = vector.extract_strided_slice %169 {offsets = [0, 0, 8], sizes = [2, 8, 8], strides = [1, 1, 1]} : vector<2x8x32xf32> to vector<2x8x8xf32>
    "tpu.trace_start"() <{level = 10 : i32, message = "bqk,bkd->bqd"}> : () -> ()
    %cst_88 = arith.constant dense<0.000000e+00> : vector<2x1x8xf32>
    %201 = tpu.matmul %199, %200, %cst_88 {dimension_numbers = #tpu.dot_dimension_numbers<[2], [1], [1], [2], [0, 0, 0, 1, 1, 2], [0], [0]>} : vector<2x1x8xf32>, vector<2x8x8xf32>, vector<2x1x8xf32> -> vector<2x1x8xf32>
    "tpu.trace_stop"() : () -> ()
    %202 = vector.extract_strided_slice %170 {offsets = [0, 0, 16], sizes = [2, 1, 8], strides = [1, 1, 1]} : vector<2x1x32xf32> to vector<2x1x8xf32>
    %203 = vector.extract_strided_slice %168 {offsets = [0, 0, 16], sizes = [2, 8, 8], strides = [1, 1, 1]} : vector<2x8x32xf32> to vector<2x8x8xf32>
    "tpu.trace_start"() <{level = 10 : i32, message = "bqd,bkd->bqk"}> : () -> ()
    %cst_89 = arith.constant dense<0.000000e+00> : vector<2x1x8xf32>
    %204 = tpu.matmul %202, %203, %cst_89 {dimension_numbers = #tpu.dot_dimension_numbers<[2], [2], [1], [1], [0, 0, 0, 1, 1, 1], [0], [0]>} : vector<2x1x8xf32>, vector<2x8x8xf32>, vector<2x1x8xf32> -> vector<2x1x8xf32>
    "tpu.trace_stop"() : () -> ()
    %cst_90 = arith.constant dense<0xFF800000> : vector<2x1xf32>
    %205 = vector.multi_reduction <maximumf>, %204, %cst_90 [2] : vector<2x1x8xf32> to vector<2x1xf32>
    %206 = vector.shape_cast %205 : vector<2x1xf32> to vector<2x1x1xf32>
    %207 = vector.broadcast %206 : vector<2x1x1xf32> to vector<2x1x8xf32>
    %208 = arith.subf %204, %207 : vector<2x1x8xf32>
    %209 = math.exp %208 : vector<2x1x8xf32>
    %cst_91 = arith.constant dense<0.000000e+00> : vector<2x1xf32>
    %210 = vector.multi_reduction <add>, %209, %cst_91 [2] : vector<2x1x8xf32> to vector<2x1xf32>
    %211 = vector.shape_cast %210 : vector<2x1xf32> to vector<2x1x1xf32>
    %212 = vector.broadcast %211 : vector<2x1x1xf32> to vector<2x1x8xf32>
    %213 = arith.divf %209, %212 : vector<2x1x8xf32>
    %214 = vector.extract_strided_slice %169 {offsets = [0, 0, 16], sizes = [2, 8, 8], strides = [1, 1, 1]} : vector<2x8x32xf32> to vector<2x8x8xf32>
    "tpu.trace_start"() <{level = 10 : i32, message = "bqk,bkd->bqd"}> : () -> ()
    %cst_92 = arith.constant dense<0.000000e+00> : vector<2x1x8xf32>
    %215 = tpu.matmul %213, %214, %cst_92 {dimension_numbers = #tpu.dot_dimension_numbers<[2], [1], [1], [2], [0, 0, 0, 1, 1, 2], [0], [0]>} : vector<2x1x8xf32>, vector<2x8x8xf32>, vector<2x1x8xf32> -> vector<2x1x8xf32>
    "tpu.trace_stop"() : () -> ()
    %216 = vector.extract_strided_slice %170 {offsets = [0, 0, 24], sizes = [2, 1, 8], strides = [1, 1, 1]} : vector<2x1x32xf32> to vector<2x1x8xf32>
    %217 = vector.extract_strided_slice %168 {offsets = [0, 0, 24], sizes = [2, 8, 8], strides = [1, 1, 1]} : vector<2x8x32xf32> to vector<2x8x8xf32>
    "tpu.trace_start"() <{level = 10 : i32, message = "bqd,bkd->bqk"}> : () -> ()
    %cst_93 = arith.constant dense<0.000000e+00> : vector<2x1x8xf32>
    %218 = tpu.matmul %216, %217, %cst_93 {dimension_numbers = #tpu.dot_dimension_numbers<[2], [2], [1], [1], [0, 0, 0, 1, 1, 1], [0], [0]>} : vector<2x1x8xf32>, vector<2x8x8xf32>, vector<2x1x8xf32> -> vector<2x1x8xf32>
    "tpu.trace_stop"() : () -> ()
    %cst_94 = arith.constant dense<0xFF800000> : vector<2x1xf32>
    %219 = vector.multi_reduction <maximumf>, %218, %cst_94 [2] : vector<2x1x8xf32> to vector<2x1xf32>
    %220 = vector.shape_cast %219 : vector<2x1xf32> to vector<2x1x1xf32>
    %221 = vector.broadcast %220 : vector<2x1x1xf32> to vector<2x1x8xf32>
    %222 = arith.subf %218, %221 : vector<2x1x8xf32>
    %223 = math.exp %222 : vector<2x1x8xf32>
    %cst_95 = arith.constant dense<0.000000e+00> : vector<2x1xf32>
    %224 = vector.multi_reduction <add>, %223, %cst_95 [2] : vector<2x1x8xf32> to vector<2x1xf32>
    %225 = vector.shape_cast %224 : vector<2x1xf32> to vector<2x1x1xf32>
    %226 = vector.broadcast %225 : vector<2x1x1xf32> to vector<2x1x8xf32>
    %227 = arith.divf %223, %226 : vector<2x1x8xf32>
    %228 = vector.extract_strided_slice %169 {offsets = [0, 0, 24], sizes = [2, 8, 8], strides = [1, 1, 1]} : vector<2x8x32xf32> to vector<2x8x8xf32>
    "tpu.trace_start"() <{level = 10 : i32, message = "bqk,bkd->bqd"}> : () -> ()
    %cst_96 = arith.constant dense<0.000000e+00> : vector<2x1x8xf32>
    %229 = tpu.matmul %227, %228, %cst_96 {dimension_numbers = #tpu.dot_dimension_numbers<[2], [1], [1], [2], [0, 0, 0, 1, 1, 2], [0], [0]>} : vector<2x1x8xf32>, vector<2x8x8xf32>, vector<2x1x8xf32> -> vector<2x1x8xf32>
    "tpu.trace_stop"() : () -> ()
    %230 = tpu.concatenate %187, %201, %215, %229 in 2 : vector<2x1x8xf32>, vector<2x1x8xf32>, vector<2x1x8xf32>, vector<2x1x8xf32> -> vector<2x1x32xf32>
    %231 = vector.shape_cast %230 : vector<2x1x32xf32> to vector<2x32xf32>
    %c1_97 = arith.constant 1 : index
    %c0_98 = arith.constant 0 : index
    %c0_99 = arith.constant 0 : index
    %232 = vector.load %arg7[%c1_97, %c0_98, %c0_99] : memref<2x32x32xf32, #tpu.memory_space<vmem>>, vector<1x32x32xf32>
    %233 = vector.shape_cast %232 : vector<1x32x32xf32> to vector<32x32xf32>
    %cst_100 = arith.constant dense<0.000000e+00> : vector<2x32xf32>
    %234 = tpu.matmul %231, %233, %cst_100 {dimension_numbers = #tpu.dot_dimension_numbers<[1], [0], [0], [1], [0, 0, 1, 1], [], []>} : vector<2x32xf32>, vector<32x32xf32>, vector<2x32xf32> -> vector<2x32xf32>
    %c1_101 = arith.constant 1 : index
    %c0_102 = arith.constant 0 : index
    %c0_103 = arith.constant 0 : index
    %235 = vector.load %arg8[%c1_101, %c0_102, %c0_103] : memref<2x1x32xf32, #tpu.memory_space<vmem>>, vector<1x1x32xf32>
    %236 = vector.shape_cast %235 : vector<1x1x32xf32> to vector<1x32xf32>
    %237 = vector.broadcast %236 : vector<1x32xf32> to vector<2x32xf32>
    %238 = arith.addf %234, %237 : vector<2x32xf32>
    %239 = arith.addf %173, %238 : vector<2x32xf32>
    %c1_104 = arith.constant 1 : index
    %c0_105 = arith.constant 0 : index
    %c0_106 = arith.constant 0 : index
    %240 = vector.load %arg9[%c1_104, %c0_105, %c0_106] : memref<2x1x32xf32, #tpu.memory_space<vmem>>, vector<1x1x32xf32>
    %241 = vector.shape_cast %240 : vector<1x1x32xf32> to vector<1x32xf32>
    %c1_107 = arith.constant 1 : index
    %c0_108 = arith.constant 0 : index
    %c0_109 = arith.constant 0 : index
    %242 = vector.load %arg10[%c1_107, %c0_108, %c0_109] : memref<2x1x32xf32, #tpu.memory_space<vmem>>, vector<1x1x32xf32>
    %243 = vector.shape_cast %242 : vector<1x1x32xf32> to vector<1x32xf32>
    %cst_110 = arith.constant dense<0.000000e+00> : vector<2xf32>
    %244 = vector.multi_reduction <add>, %239, %cst_110 [1] : vector<2x32xf32> to vector<2xf32>
    %245 = vector.shape_cast %244 : vector<2xf32> to vector<2x1xf32>
    %cst_111 = arith.constant 3.200000e+01 : f32
    %246 = vector.broadcast %cst_111 : f32 to vector<2x1xf32>
    %247 = arith.divf %245, %246 : vector<2x1xf32>
    %248 = vector.broadcast %247 : vector<2x1xf32> to vector<2x32xf32>
    %249 = arith.subf %239, %248 : vector<2x32xf32>
    %250 = arith.mulf %249, %249 : vector<2x32xf32>
    %cst_112 = arith.constant dense<0.000000e+00> : vector<2xf32>
    %251 = vector.multi_reduction <add>, %250, %cst_112 [1] : vector<2x32xf32> to vector<2xf32>
    %252 = vector.shape_cast %251 : vector<2xf32> to vector<2x1xf32>
    %cst_113 = arith.constant 3.200000e+01 : f32
    %253 = vector.broadcast %cst_113 : f32 to vector<2x1xf32>
    %254 = arith.divf %252, %253 : vector<2x1xf32>
    %255 = vector.broadcast %247 : vector<2x1xf32> to vector<2x32xf32>
    %256 = arith.subf %239, %255 : vector<2x32xf32>
    %cst_114 = arith.constant 9.99999974E-6 : f32
    %257 = vector.broadcast %cst_114 : f32 to vector<2x1xf32>
    %258 = arith.addf %254, %257 : vector<2x1xf32>
    %259 = math.rsqrt %258 : vector<2x1xf32>
    %260 = vector.broadcast %259 : vector<2x1xf32> to vector<2x32xf32>
    %261 = arith.mulf %256, %260 : vector<2x32xf32>
    %262 = vector.broadcast %241 : vector<1x32xf32> to vector<2x32xf32>
    %263 = arith.mulf %261, %262 : vector<2x32xf32>
    %264 = vector.broadcast %243 : vector<1x32xf32> to vector<2x32xf32>
    %265 = arith.addf %263, %264 : vector<2x32xf32>
    %c1_115 = arith.constant 1 : index
    %c0_116 = arith.constant 0 : index
    %c0_117 = arith.constant 0 : index
    %266 = vector.load %arg11[%c1_115, %c0_116, %c0_117] : memref<2x32x64xf32, #tpu.memory_space<vmem>>, vector<1x32x64xf32>
    %267 = vector.shape_cast %266 : vector<1x32x64xf32> to vector<32x64xf32>
    %cst_118 = arith.constant dense<0.000000e+00> : vector<2x64xf32>
    %268 = tpu.matmul %265, %267, %cst_118 {dimension_numbers = #tpu.dot_dimension_numbers<[1], [0], [0], [1], [0, 0, 1, 1], [], []>} : vector<2x32xf32>, vector<32x64xf32>, vector<2x64xf32> -> vector<2x64xf32>
    %c1_119 = arith.constant 1 : index
    %c0_120 = arith.constant 0 : index
    %c0_121 = arith.constant 0 : index
    %269 = vector.load %arg12[%c1_119, %c0_120, %c0_121] : memref<2x1x64xf32, #tpu.memory_space<vmem>>, vector<1x1x64xf32>
    %270 = vector.shape_cast %269 : vector<1x1x64xf32> to vector<1x64xf32>
    %271 = vector.broadcast %270 : vector<1x64xf32> to vector<2x64xf32>
    %272 = arith.addf %268, %271 : vector<2x64xf32>
    %cst_122 = arith.constant 0.000000e+00 : f32
    %273 = vector.broadcast %cst_122 : f32 to vector<2x64xf32>
    %274 = arith.maximumf %272, %273 : vector<2x64xf32>
    %c1_123 = arith.constant 1 : index
    %c0_124 = arith.constant 0 : index
    %c0_125 = arith.constant 0 : index
    %275 = vector.load %arg13[%c1_123, %c0_124, %c0_125] : memref<2x64x32xf32, #tpu.memory_space<vmem>>, vector<1x64x32xf32>
    %276 = vector.shape_cast %275 : vector<1x64x32xf32> to vector<64x32xf32>
    %cst_126 = arith.constant dense<0.000000e+00> : vector<2x32xf32>
    %277 = tpu.matmul %274, %276, %cst_126 {dimension_numbers = #tpu.dot_dimension_numbers<[1], [0], [0], [1], [0, 0, 1, 1], [], []>} : vector<2x64xf32>, vector<64x32xf32>, vector<2x32xf32> -> vector<2x32xf32>
    %c1_127 = arith.constant 1 : index
    %c0_128 = arith.constant 0 : index
    %c0_129 = arith.constant 0 : index
    %278 = vector.load %arg14[%c1_127, %c0_128, %c0_129] : memref<2x1x32xf32, #tpu.memory_space<vmem>>, vector<1x1x32xf32>
    %279 = vector.shape_cast %278 : vector<1x1x32xf32> to vector<1x32xf32>
    %280 = vector.broadcast %279 : vector<1x32xf32> to vector<2x32xf32>
    %281 = arith.addf %277, %280 : vector<2x32xf32>
    %282 = arith.addf %265, %281 : vector<2x32xf32>
    %c1_130 = arith.constant 1 : index
    %c0_131 = arith.constant 0 : index
    %c0_132 = arith.constant 0 : index
    %283 = vector.load %arg15[%c1_130, %c0_131, %c0_132] : memref<2x1x32xf32, #tpu.memory_space<vmem>>, vector<1x1x32xf32>
    %284 = vector.shape_cast %283 : vector<1x1x32xf32> to vector<1x32xf32>
    %c1_133 = arith.constant 1 : index
    %c0_134 = arith.constant 0 : index
    %c0_135 = arith.constant 0 : index
    %285 = vector.load %arg16[%c1_133, %c0_134, %c0_135] : memref<2x1x32xf32, #tpu.memory_space<vmem>>, vector<1x1x32xf32>
    %286 = vector.shape_cast %285 : vector<1x1x32xf32> to vector<1x32xf32>
    %cst_136 = arith.constant dense<0.000000e+00> : vector<2xf32>
    %287 = vector.multi_reduction <add>, %282, %cst_136 [1] : vector<2x32xf32> to vector<2xf32>
    %288 = vector.shape_cast %287 : vector<2xf32> to vector<2x1xf32>
    %cst_137 = arith.constant 3.200000e+01 : f32
    %289 = vector.broadcast %cst_137 : f32 to vector<2x1xf32>
    %290 = arith.divf %288, %289 : vector<2x1xf32>
    %291 = vector.broadcast %290 : vector<2x1xf32> to vector<2x32xf32>
    %292 = arith.subf %282, %291 : vector<2x32xf32>
    %293 = arith.mulf %292, %292 : vector<2x32xf32>
    %cst_138 = arith.constant dense<0.000000e+00> : vector<2xf32>
    %294 = vector.multi_reduction <add>, %293, %cst_138 [1] : vector<2x32xf32> to vector<2xf32>
    %295 = vector.shape_cast %294 : vector<2xf32> to vector<2x1xf32>
    %cst_139 = arith.constant 3.200000e+01 : f32
    %296 = vector.broadcast %cst_139 : f32 to vector<2x1xf32>
    %297 = arith.divf %295, %296 : vector<2x1xf32>
    %298 = vector.broadcast %290 : vector<2x1xf32> to vector<2x32xf32>
    %299 = arith.subf %282, %298 : vector<2x32xf32>
    %cst_140 = arith.constant 9.99999974E-6 : f32
    %300 = vector.broadcast %cst_140 : f32 to vector<2x1xf32>
    %301 = arith.addf %297, %300 : vector<2x1xf32>
    %302 = math.rsqrt %301 : vector<2x1xf32>
    %303 = vector.broadcast %302 : vector<2x1xf32> to vector<2x32xf32>
    %304 = arith.mulf %299, %303 : vector<2x32xf32>
    %305 = vector.broadcast %284 : vector<1x32xf32> to vector<2x32xf32>
    %306 = arith.mulf %304, %305 : vector<2x32xf32>
    %307 = vector.broadcast %286 : vector<1x32xf32> to vector<2x32xf32>
    %308 = arith.addf %306, %307 : vector<2x32xf32>
    %c0_141 = arith.constant 0 : index
    %c0_142 = arith.constant 0 : index
    %309 = vector.load %arg17[%c0_141, %c0_142] : memref<32x128xf32, #tpu.memory_space<vmem>>, vector<32x128xf32>
    %cst_143 = arith.constant dense<0.000000e+00> : vector<2x128xf32>
    %310 = tpu.matmul %308, %309, %cst_143 {dimension_numbers = #tpu.dot_dimension_numbers<[1], [0], [0], [1], [0, 0, 1, 1], [], []>} : vector<2x32xf32>, vector<32x128xf32>, vector<2x128xf32> -> vector<2x128xf32>
    %c0_144 = arith.constant 0 : index
    %c0_145 = arith.constant 0 : index
    %311 = vector.load %arg18[%c0_144, %c0_145] : memref<1x128xf32, #tpu.memory_space<vmem>>, vector<1x128xf32>
    %312 = vector.broadcast %311 : vector<1x128xf32> to vector<2x128xf32>
    %313 = arith.addf %310, %312 : vector<2x128xf32>
    %314 = vector.shape_cast %313 : vector<2x128xf32> to vector<2x1x128xf32>
    %c0_146 = arith.constant 0 : index
    %c0_147 = arith.constant 0 : index
    %c0_148 = arith.constant 0 : index
    %315 = vector.load %arg19[%c0_146, %c0_147, %c0_148] : memref<2x1x128xf32, #tpu.memory_space<vmem>>, vector<2x1x128xf32>
    tpu.vector_store %arg19[%c0_146, %c0_147, %c0_148], %314 {strides = array<i32>} : memref<2x1x128xf32, #tpu.memory_space<vmem>>, vector<2x1x128xf32>,
    return
  }
  func.func @transform_0(%arg0: i32) -> (i32, i32, i32) {
    %c0_i32 = arith.constant 0 : i32
    %c0_i32_0 = arith.constant 0 : i32
    %c0_i32_1 = arith.constant 0 : i32
    return %arg0, %c0_i32, %c0_i32_0 : i32, i32, i32
  }
  func.func @transform_1(%arg0: i32) -> (i32, i32) {
    %c0_i32 = arith.constant 0 : i32
    %c0_i32_0 = arith.constant 0 : i32
    %c0_i32_1 = arith.constant 0 : i32
    return %c0_i32, %c0_i32_0 : i32, i32
  }
  func.func @transform_2(%arg0: i32) -> (i32, i32) {
    %c0_i32 = arith.constant 0 : i32
    %c0_i32_0 = arith.constant 0 : i32
    %c0_i32_1 = arith.constant 0 : i32
    return %c0_i32, %c0_i32_0 : i32, i32
  }
  func.func @transform_3(%arg0: i32) -> (i32, i32) {
    %c0_i32 = arith.constant 0 : i32
    %c0_i32_0 = arith.constant 0 : i32
    %c0_i32_1 = arith.constant 0 : i32
    return %c0_i32, %c0_i32_0 : i32, i32
  }
  func.func @transform_4(%arg0: i32) -> (i32, i32, i32) {
    %c0_i32 = arith.constant 0 : i32
    %c0_i32_0 = arith.constant 0 : i32
    %c0_i32_1 = arith.constant 0 : i32
    %c0_i32_2 = arith.constant 0 : i32
    return %c0_i32, %c0_i32_0, %c0_i32_1 : i32, i32, i32
  }
  func.func @transform_5(%arg0: i32) -> (i32, i32, i32) {
    %c0_i32 = arith.constant 0 : i32
    %c0_i32_0 = arith.constant 0 : i32
    %c0_i32_1 = arith.constant 0 : i32
    %c0_i32_2 = arith.constant 0 : i32
    return %c0_i32, %c0_i32_0, %c0_i32_1 : i32, i32, i32
  }
  func.func @transform_6(%arg0: i32) -> (i32, i32, i32) {
    %c0_i32 = arith.constant 0 : i32
    %c0_i32_0 = arith.constant 0 : i32
    %c0_i32_1 = arith.constant 0 : i32
    %c0_i32_2 = arith.constant 0 : i32
    return %c0_i32, %c0_i32_0, %c0_i32_1 : i32, i32, i32
  }
  func.func @transform_7(%arg0: i32) -> (i32, i32, i32) {
    %c0_i32 = arith.constant 0 : i32
    %c0_i32_0 = arith.constant 0 : i32
    %c0_i32_1 = arith.constant 0 : i32
    %c0_i32_2 = arith.constant 0 : i32
    return %c0_i32, %c0_i32_0, %c0_i32_1 : i32, i32, i32
  }
  func.func @transform_8(%arg0: i32) -> (i32, i32, i32) {
    %c0_i32 = arith.constant 0 : i32
    %c0_i32_0 = arith.constant 0 : i32
    %c0_i32_1 = arith.constant 0 : i32
    %c0_i32_2 = arith.constant 0 : i32
    return %c0_i32, %c0_i32_0, %c0_i32_1 : i32, i32, i32
  }
  func.func @transform_9(%arg0: i32) -> (i32, i32, i32) {
    %c0_i32 = arith.constant 0 : i32
    %c0_i32_0 = arith.constant 0 : i32
    %c0_i32_1 = arith.constant 0 : i32
    %c0_i32_2 = arith.constant 0 : i32
    return %c0_i32, %c0_i32_0, %c0_i32_1 : i32, i32, i32
  }
  func.func @transform_10(%arg0: i32) -> (i32, i32, i32) {
    %c0_i32 = arith.constant 0 : i32
    %c0_i32_0 = arith.constant 0 : i32
    %c0_i32_1 = arith.constant 0 : i32
    %c0_i32_2 = arith.constant 0 : i32
    return %c0_i32, %c0_i32_0, %c0_i32_1 : i32, i32, i32
  }
  func.func @transform_11(%arg0: i32) -> (i32, i32, i32) {
    %c0_i32 = arith.constant 0 : i32
    %c0_i32_0 = arith.constant 0 : i32
    %c0_i32_1 = arith.constant 0 : i32
    %c0_i32_2 = arith.constant 0 : i32
    return %c0_i32, %c0_i32_0, %c0_i32_1 : i32, i32, i32
  }
  func.func @transform_12(%arg0: i32) -> (i32, i32, i32) {
    %c0_i32 = arith.constant 0 : i32
    %c0_i32_0 = arith.constant 0 : i32
    %c0_i32_1 = arith.constant 0 : i32
    %c0_i32_2 = arith.constant 0 : i32
    return %c0_i32, %c0_i32_0, %c0_i32_1 : i32, i32, i32
  }
  func.func @transform_13(%arg0: i32) -> (i32, i32, i32) {
    %c0_i32 = arith.constant 0 : i32
    %c0_i32_0 = arith.constant 0 : i32
    %c0_i32_1 = arith.constant 0 : i32
    %c0_i32_2 = arith.constant 0 : i32
    return %c0_i32, %c0_i32_0, %c0_i32_1 : i32, i32, i32
  }
  func.func @transform_14(%arg0: i32) -> (i32, i32, i32) {
    %c0_i32 = arith.constant 0 : i32
    %c0_i32_0 = arith.constant 0 : i32
    %c0_i32_1 = arith.constant 0 : i32
    %c0_i32_2 = arith.constant 0 : i32
    return %c0_i32, %c0_i32_0, %c0_i32_1 : i32, i32, i32
  }
  func.func @transform_15(%arg0: i32) -> (i32, i32, i32) {
    %c0_i32 = arith.constant 0 : i32
    %c0_i32_0 = arith.constant 0 : i32
    %c0_i32_1 = arith.constant 0 : i32
    %c0_i32_2 = arith.constant 0 : i32
    return %c0_i32, %c0_i32_0, %c0_i32_1 : i32, i32, i32
  }
  func.func @transform_16(%arg0: i32) -> (i32, i32) {
    %c0_i32 = arith.constant 0 : i32
    %c0_i32_0 = arith.constant 0 : i32
    %c0_i32_1 = arith.constant 0 : i32
    return %c0_i32, %c0_i32_0 : i32, i32
  }
  func.func @transform_17(%arg0: i32) -> (i32, i32) {
    %c0_i32 = arith.constant 0 : i32
    %c0_i32_0 = arith.constant 0 : i32
    %c0_i32_1 = arith.constant 0 : i32
    return %c0_i32, %c0_i32_0 : i32, i32
  }
  func.func @transform_18(%arg0: i32) -> (i32, i32, i32) {
    %c0_i32 = arith.constant 0 : i32
    %c0_i32_0 = arith.constant 0 : i32
    %c0_i32_1 = arith.constant 0 : i32
    return %arg0, %c0_i32, %c0_i32_0 : i32, i32, i32
  }
}

</mosaic_0001>

<bundles_post_ra>
// kernel: tpu_custom_call.1
= control target key start
LH: loop header
LB: loop body
LE: loop exit
PB: predicated region body
PF: predicated region fallthrough
CT: control target
= control target key end

     0   :  { %s3328_s0 = inlined_call_operand.hbm [shape: f32[2,8,16], index: 0, kind: input, shape index: {}]   ;;  %s3329_s1 = inlined_call_operand.hbm [shape: f32[8,32], index: 1, kind: input, shape index: {}]   ;;  %s3330_s2 = inlined_call_operand.hbm [shape: f32[16,32], index: 2, kind: input, shape index: {}]   ;;  %s3331_s3 = inlined_call_operand.hbm [shape: f32[1,32], index: 3, kind: input, shape index: {}]   ;;  %s3332_s4 = inlined_call_operand.vmem [shape: f32[2,32,96], index: 4, kind: input, shape index: {}]   ;;  %s3333_s5 = inlined_call_operand.vmem [shape: f32[2,1,96], index: 5, kind: input, shape index: {}]   ;;  %s3334_s6 = inlined_call_operand.vmem [shape: f32[2,32,32], index: 6, kind: input, shape index: {}]   ;;  %s3335_s7 = inlined_call_operand.vmem [shape: f32[2,1,32], index: 7, kind: input, shape index: {}]   ;;  %s3336_s8 = inlined_call_operand.hbm [shape: f32[2,1,32], index: 8, kind: input, shape index: {}]   ;;  %s3337_s9 = inlined_call_operand.vmem [shape: f32[2,1,32], index: 9, kind: input, shape index: {}]   ;;  %s3338_s10 = inlined_call_operand.vmem [shape: f32[2,32,64], index: 10, kind: input, shape index: {}]   ;;  %s3339_s11 = inlined_call_operand.vmem [shape: f32[2,1,64], index: 11, kind: input, shape index: {}]   ;;  %s3340_s12 = inlined_call_operand.vmem [shape: f32[2,64,32], index: 12, kind: input, shape index: {}]   ;;  %s3341_s13 = inlined_call_operand.vmem [shape: f32[2,1,32], index: 13, kind: input, shape index: {}]   ;;  %s3342_s14 = inlined_call_operand.hbm [shape: f32[2,1,32], index: 14, kind: input, shape index: {}]   ;;  %s3343_s15 = inlined_call_operand.vmem [shape: f32[2,1,32], index: 15, kind: input, shape index: {}]   ;;  %s3344_s16 = inlined_call_operand.hbm [shape: f32[32,128], index: 16, kind: input, shape index: {}]   ;;  %s3345_s17 = inlined_call_operand.vmem [shape: f32[1,128], index: 17, kind: input, shape index: {}]   ;;  %s3346_s18 = inlined_call_operand.hbm [shape: f32[2,1,128], index: 18, kind: output, shape index: {}]  }
   0x1   :  { %3353 = sst [smem:[#allocation20_spill]] %s3328_s0 }
   0x2   :  { %3354 = sst [smem:[#allocation21_spill]] %s3329_s1 }
   0x3   :  { %3355 = sst [smem:[#allocation22_spill]] %s3330_s2 }
   0x4   :  { %3356 = sst [smem:[#allocation23_spill]] %s3346_s18 }
   0x5   :  { %23 = vsyncpa [#allocation3], 0 }
   0x6   :  { %24 = vsyncpa [#allocation6], 0 }
   0x7   :  { %25 = vsyncpa [#allocation9], 0 }
   0x8   :  { %26 = vsyncpa [#allocation12], 0  ;;  %s3357_s29 = sld [smem:[#allocation21_spill]] }
   0xe   :  { %s46_s30 = sshll.u32 %s3357_s29, 4  ;;  %s47_s30 = int_to_ptr.hbm [resolvable:$true] %s46_s30 }
   0xf   :  { %27 = vsyncpa [#allocation4], 0  ;;  %s2616_s0 = smov [#allocation5]   ;;  %s70_s21 = sshll.u32 %s3331_s3, 4  ;;  %s71_s21 = int_to_ptr.hbm [resolvable:$true] %s70_s21 }
  0x10   :  { %s48_s19 = sshll.u32 %s2616_s0, 4  ;;  %s2617_s22 = smov [#allocation8]   ;;  %s49_s19 = int_to_ptr.vmem [resolvable:$true] %s48_s19 }
  0x11   :  { %51 = dma.hbm_to_vmem [thread:$0]  %s47_s30, 128, %s49_s19, [#allocation6]  }
  0x12   :  { %s72_s2 = sshll.u32 %s2617_s22, 4  ;;  %s111_s25 = sshll.u32 %s3342_s14, 4  ;;  %s73_s2 = int_to_ptr.vmem [resolvable:$true] %s72_s2  ;;  %s112_s25 = int_to_ptr.hbm [resolvable:$true] %s111_s25 }
  0x13   :  { %75 = dma.hbm_to_vmem [thread:$0]  %s71_s21, 16, %s73_s2, [#allocation9]  }
  0x14   :  { %s2618_s26 = smov [#allocation11]   ;;  %s3358_s0 = sld [smem:[#allocation20_spill]] }
  0x15   :  { %s113_s27 = sshll.u32 %s2618_s26, 4  ;;  %s3347_s1 = smov 16   ;;  %s114_s27 = int_to_ptr.vmem [resolvable:$true] %s113_s27 }
  0x16   :  { %s3349_s3 = smov 1   ;;  %s2621_s30 = smov [#allocation2]  }
  0x17   :  { %119 = dma.hbm_to_vmem [thread:$0]  %s112_s25, 32, %s114_s27, [#allocation12], %s3347_s1, %s3347_s1, %s3349_s3  }
  0x18   :  { %s34_s19 = sshll.u32 %s2621_s30, 4  ;;  %s2622_s20 = smov 128   ;;  %s35_s19 = int_to_ptr.vmem [resolvable:$true] %s34_s19 }
  0x19   :  { %s3350_s14 = smov 8   ;;  %s3359_s2 = sld [smem:[#allocation22_spill]] }
  0x1a   :  { %s32_s18 = sshll.u32 %s3358_s0, 4  ;;  %s2624_s24 = smov [#allocation7]   ;;  %s33_s18 = int_to_ptr.hbm [resolvable:$true] %s32_s18 }
  0x1b   :  { %40 = dma.hbm_to_vmem [thread:$0]  %s33_s18, 256, %s35_s19, [#allocation3], %s2622_s20, %s2622_s20, %s3350_s14  }
  0x1c   :  { %s58_s26 = sshll.u32 %s2624_s24, 4  ;;  %s88_s25 = sshll.u32 %s3336_s8, 4  ;;  %s59_s26 = int_to_ptr.vmem [resolvable:$true] %s58_s26  ;;  %s89_s25 = int_to_ptr.hbm [resolvable:$true] %s88_s25 }
  0x1d   :  { %s2625_s27 = smov [#allocation10]   ;;  %s126_s18 = sshll.u32 %s3344_s16, 4  ;;  %s127_s18 = int_to_ptr.hbm [resolvable:$true] %s126_s18 }
  0x1e   :  { %s90_s0 = sshll.u32 %s2625_s27, 4  ;;  %s3360_s19 = smov 16   ;;  %s91_s0 = int_to_ptr.vmem [resolvable:$true] %s90_s0 }
  0x1f   :  { %s56_s23 = sshll.u32 %s3359_s2, 4  ;;  %s2626_s21 = smov [#allocation13]   ;;  %s57_s23 = int_to_ptr.hbm [resolvable:$true] %s56_s23 }
  0x20   :  { %64 = dma.hbm_to_vmem [thread:$0]  %s57_s23, 256, %s59_s26, [#allocation6], %s2622_s20, %s2622_s20, %s3350_s14  }
  0x21   :  { %96 = dma.hbm_to_vmem [thread:$0]  %s89_s25, 32, %s91_s0, [#allocation9], %s3360_s19, %s3360_s19, %s3349_s3  }
  0x22   :  { %s128_s22 = sshll.u32 %s2626_s21, 4  ;;  %s129_s22 = int_to_ptr.vmem [resolvable:$true] %s128_s22 }
  0x23   :  { %134 = dma.hbm_to_vmem [thread:$0]  %s127_s18, 512, %s129_s22, [#allocation12], %s2622_s20, %s2622_s20, %s3350_s14  }
  0x24   :  { %2606 = dma.done.wait [#allocation3], 256  }
  0x25   :  { %2607 = vsyncadd [#allocation3], 4294967040 }
  0x26   :  { %2608 = dma.done.wait [#allocation6], 384  }
  0x27   :  { %2609 = vsyncadd [#allocation6], 4294966912 }
  0x28   :  { %2610 = dma.done.wait [#allocation9], 48  }
  0x29   :  { %2611 = vsyncadd [#allocation9], 4294967248 }
  0x2a   :  { %2612 = dma.done.wait [#allocation12], 544  }
  0x2b   :  { %2613 = vsyncadd [#allocation12], 4294966752  ;;  %v168_v0 = vld [vmem:[#allocation7 + $0x8] sm:$0xff]  ;;  %v167_v1 = vld [vmem:[#allocation7] sm:$0xff]  ;;  %vm173_vm0 = vcmask 130048   ;;  %vm214_vm1 = vcmask 261120  }
  0x2c   :  { %194 = vmatpush.msra.mxu0 %v168_v0  ;;  %v165_v2 = vld [vmem:[#allocation2] sm:$0xff]  ;;  %v209_v3 = vld [vmem:[%s3332_s4 + $0x18] sm:$0xff]  ;;  %v208_v4 = vld [vmem:[%s3332_s4 + $0x10] sm:$0xff]  ;;  %s2627_s25 = smov 96   ;;  %vm247_vm2 = vcmask 64512   ;;  %s2628_s27 = smov 88  }
  0x2d   :  { %233 = vmatpush.msra.mxu1 %v209_v3  ;;  %v207_v5 = vld [vmem:[%s3332_s4 + $0x8] sm:$0xff]  ;;  %v206_v6 = vld [vmem:[%s3332_s4] sm:$0xff]  ;;  %v203_v9 = vld [vmem:[#allocation5] sm:$0xff]  ;;  %s2629_s0 = smov 80   ;;  %s3352_s30 = smov 56  }
  0x2e   :  { %195 = vmatpush.msra.mxu0 %v167_v1  ;;  %v2314_v7 = vld [vmem:[#allocation8] ss:$0 sm:$0xff]  ;;  %v2315_v13 = vld [vmem:[%s3333_s5] ss:$0 sm:$0xff]  ;;  %s2631_s18 = smov 120   ;;  %s2632_s21 = smov 72  }
  0x2f   :  { %2179 = vmatmul.msk.f32.vlgmr.msra.gmra.mxu0 %vm173_vm0, %v165_v2  ;;  %234 = vmatpush.msra.mxu1 %v208_v4  ;;  %v166_v12 = vld [vmem:[#allocation2 + $0x8] sm:$0xff]  ;;  %s2633_s22 = smov 104   ;;  %s2634_s8 = smov 64  }
  0x30   :  { %s2635_s16 = smov 112   ;;  %s2636_s1 = smov 40  }
  0x31   :  { %235 = vmatpush.msra.mxu1 %v207_v5  ;;  %s2637_s20 = smov 48   ;;  %s2638_s2 = smov 24  }
  0x32   :  { %s2640_s29 = smov [#allocation14]  }
  0x33   :  { %236 = vmatpush.msra.mxu1 %v206_v6 }
  0x37   :  { %2180 = vmatmul.msk.f32.gmra.mxu0 %vm173_vm0, %v166_v12 }
  0xac   :  { %v197_v8 = vpop.f32.mrf.mxu0 }
  0xad   :  { %v198_v10 = vadd.f32 %v2314_v7, %v197_v8 }
  0xaf   :  { %v2779_v11 = vadd.f32 %v203_v9, %v198_v10 }
  0xb1   :  { %2181 = vmatmul.msk.f32.vlgmr.msra.gmra.mxu1 %vm214_vm1, %v2779_v11 }
  0xb4   :  { %v200_v16 = vpop.f32.mrf.mxu0 }
  0xb5   :  { %v201_v17 = vadd.f32 %v2314_v7, %v200_v16 }
  0xb7   :  { %v2791_v18 = vadd.f32 %v203_v9, %v201_v17 }
  0xb9   :  { %2182 = vmatmul.msk.f32.gmra.mxu1 %vm214_vm1, %v2791_v18 }
 0x12e   :  { %v238_v14 = vpop.f32.mrf.mxu1 }
 0x12f   :  { %v2787_v15 = vadd.f32 %v2315_v13, %v238_v14 }
 0x131   :  { %245 = vrot.lane.b32.xlu0 %v2787_v15, %s2627_s25 }
 0x136   :  { %v241_v20 = vpop.f32.mrf.mxu1 }
 0x137   :  { %v2798_v21 = vadd.f32 %v2315_v13, %v241_v20 }
 0x139   :  { %429 = vrot.lane.b32.xlu2 %v2798_v21, %s2628_s27 }
 0x141   :  { %427 = vrot.lane.b32.xlu2 %v2798_v21, %s2631_s18 }
 0x193   :  { %v430_v42 = vpop.permute.xlu2 %429 }
 0x19b   :  { %v428_v47 = vpop.permute.xlu2 %427 }
 0x1a3   :  { %v246_v19 = vpop.permute.xlu0 %245 }
 0x1a4   :  { %2183 = vmatpush.xpose.msk.msra.mxu2 %vm247_vm2, %v246_v19 }
 0x1a7   :  { %2184 = vmatmul.msk.f32.vlgmr.msra.gmra.mxu2 %vm247_vm2, %v2787_v15 }
 0x22a   :  { %v269_v22 = vpop.f32.mrf.mxu2 }
 0x22b   :  { %v299_v23 = vsel %vm247_vm2, %v269_v22, -inf }
 0x22c   :  { %300 = vmax.xlane.f32.xlu0 %v299_v23 }
 0x240   :  { %401 = vrot.lane.b32.xlu0 %v2787_v15, %s2628_s27 }
 0x248   :  { %557 = vrot.lane.b32.xlu0 %v2787_v15, %s2629_s0 }
 0x250   :  { %529 = vrot.lane.b32.xlu0 %v2798_v21, %s3352_s30 }
 0x258   :  { %713 = vrot.lane.b32.xlu0 %v2787_v15, %s2632_s21 }
 0x260   :  { %711 = vrot.lane.b32.xlu0 %v2787_v15, %s2633_s22 }
 0x268   :  { %739 = vrot.lane.b32.xlu0 %v2798_v21, %s2633_s22 }
 0x29f   :  { %v301_v24 = vpop.xlane.xlu0 %300 }
 0x2a0   :  { %v305_v25 = vsub.f32 %v269_v22, %v301_v24 }
 0x2a2   :  { %v307_v26 = vmul.f32 1.442695, %v305_v25 }
 0x2a4   :  { %2332 = vpow2.f32 %v307_v26 }
 0x2aa   :  { %v2333_v27 = vpop.eup %2332 }
 0x2ab   :  { %v311_v28 = vsel %vm247_vm2, %v2333_v27, 0.0 }
 0x2ac   :  { %312 = vadd.xlane.f32.xlu1 %v311_v28 }
 0x2b2   :  { %v402_v29 = vpop.permute.xlu0 %401 }
 0x2b3   :  { %2189 = vmatpush.xpose.msk.msrb.mxu0 %vm247_vm2, %v402_v29 }
 0x2ba   :  { %v558_v30 = vpop.permute.xlu0 %557 }
 0x2bb   :  { %2195 = vmatpush.xpose.msk.msra.mxu0 %vm247_vm2, %v558_v30 }
 0x2c2   :  { %v530_v45 = vpop.permute.xlu0 %529 }
 0x2c5   :  { %347 = vrot.lane.b32.xlu1 %v2787_v15, %s2634_s8 }
 0x2ca   :  { %v714_v57 = vpop.permute.xlu0 %713 }
 0x2cd   :  { %273 = vrot.lane.b32.xlu1 %v2798_v21, %s2627_s25 }
 0x2d2   :  { %v712_v61 = vpop.permute.xlu0 %711 }
 0x2da   :  { %v740_v28 = vpop.permute.xlu0 %739 }
 0x31f   :  { %v313_v31 = vpop.xlane.xlu1 %312 }
 0x320   :  { %2334 = vrcp.f32 %v313_v31  ;;  %v328_v37 = vand.u32 2147483648, %v313_v31  ;;  %vm322_vm4 = vweird.f32 %v313_v31  ;;  %v326_v38 = vand.u32 2147483647, %v313_v31 }
 0x322   :  { %v329_v40 = vor.u32 1.1754944e-38, %v328_v37  ;;  %vm327_vm6 = vcmp.eq.f32.partialorder %v326_v38, 8.507059e+37 }
 0x326   :  { %v2335_v32 = vpop.eup %2334 }
 0x327   :  { %v318_v33 = vmul.f32 %v2335_v32, %v313_v31  ;;  %vm323_vm3 = vweird.f32 %v2335_v32 }
 0x328   :  { %vm324_vm5 = vmor %vm322_vm4, %vm323_vm3 }
 0x329   :  { %v319_v34 = vsub.f32 1.0, %v318_v33 }
 0x32b   :  { %v320_v35 = vmul.f32 %v2335_v32, %v319_v34 }
 0x32d   :  { %v321_v36 = vadd.f32 %v2335_v32, %v320_v35 }
 0x32f   :  { %v325_v39 = vsel %vm324_vm5, %v2335_v32, %v321_v36 }
 0x330   :  { %v330_v41 = vsel %vm327_vm6, %v329_v40, %v325_v39 }
 0x331   :  { %v331_v44 = vmul.f32 %v2333_v27, %v330_v41 }
 0x337   :  { %v348_v43 = vpop.permute.xlu1 %347 }
 0x338   :  { %368 = vmatpush.msrb.mxu2 %v348_v43 }
 0x339   :  { %2187 = vmatmul.msk.f32.vlgmr.msrb.gmra.mxu2 %vm247_vm2, %v331_v44 }
 0x33a   :  { %2191 = vmatpush.xpose.msk.msra.mxu2 %vm247_vm2, %v430_v42 }
 0x33e   :  { %550 = vmatpush.msrb.mxu2 %v530_v45 }
 0x33f   :  { %v274_v46 = vpop.permute.xlu1 %273 }
 0x340   :  { %2185 = vmatpush.xpose.msk.msra.mxu3 %vm247_vm2, %v274_v46 }
 0x341   :  { %2192 = vmatmul.msk.f32.vlgmr.msra.gmra.mxu2 %vm247_vm2, %v428_v47 }
 0x343   :  { %2186 = vmatmul.msk.f32.vlgmr.msra.gmra.mxu3 %vm247_vm2, %v2798_v21 }
 0x3bc   :  { %v2830_v48 = vpop.f32.mrf.mxu2 }
 0x3c4   :  { %v452_v49 = vpop.f32.mrf.mxu2 }
 0x3c5   :  { %v458_v50 = vsel %vm247_vm2, %v452_v49, -inf }
 0x3c6   :  { %459 = vmax.xlane.f32.xlu2 %v458_v50  ;;  %v296_v51 = vpop.f32.mrf.mxu3 }
 0x3c7   :  { %v302_v52 = vsel %vm247_vm2, %v296_v51, -inf }
 0x3de   :  { %399 = vrot.lane.b32.xlu2 %v2787_v15, %s2631_s18 }
 0x3e6   :  { %555 = vrot.lane.b32.xlu2 %v2787_v15, %s2635_s16 }
 0x3ee   :  { %583 = vrot.lane.b32.xlu2 %v2798_v21, %s2635_s16 }
 0x3f6   :  { %741 = vrot.lane.b32.xlu2 %v2798_v21, %s2632_s21 }
 0x41f   :  { %303 = vmax.xlane.f32.xlu2 %v302_v52 }
 0x439   :  { %v460_v53 = vpop.xlane.xlu2 %459 }
 0x43a   :  { %v462_v54 = vsub.f32 %v452_v49, %v460_v53 }
 0x43c   :  { %v465_v55 = vmul.f32 1.442695, %v462_v54 }
 0x43e   :  { %2336 = vpow2.f32 %v465_v55 }
 0x441   :  { %v400_v56 = vpop.permute.xlu2 %399 }
 0x442   :  { %2190 = vmatmul.msk.f32.vlgmr.msrb.gmra.mxu0 %vm247_vm2, %v400_v56 }
 0x443   :  { %2201 = vmatpush.xpose.msk.msrb.mxu0 %vm247_vm2, %v714_v57 }
 0x444   :  { %v2337_v58 = vpop.eup %2336 }
 0x445   :  { %v470_v59 = vsel %vm247_vm2, %v2337_v58, 0.0 }
 0x446   :  { %471 = vadd.xlane.f32.xlu1 %v470_v59 }
 0x449   :  { %v556_v60 = vpop.permute.xlu2 %555 }
 0x44a   :  { %2196 = vmatmul.msk.f32.vlgmr.msra.gmra.mxu0 %vm247_vm2, %v556_v60 }
 0x451   :  { %v584_v62 = vpop.permute.xlu2 %583 }
 0x452   :  { %2202 = vmatmul.msk.f32.vlgmr.msrb.gmra.mxu0 %vm247_vm2, %v712_v61 }
 0x459   :  { %v742_v0 = vpop.permute.xlu2 %741 }
 0x45f   :  { %585 = vrot.lane.b32.xlu1 %v2798_v21, %s2629_s0 }
 0x492   :  { %v304_v6 = vpop.xlane.xlu2 %303 }
 0x493   :  { %v306_v10 = vsub.f32 %v296_v51, %v304_v6 }
 0x495   :  { %v309_v20 = vmul.f32 1.442695, %v306_v10 }
 0x4b9   :  { %v472_v63 = vpop.xlane.xlu1 %471 }
 0x4ba   :  { %2338 = vrcp.f32 %v472_v63  ;;  %v499_v7 = vand.u32 2147483648, %v472_v63  ;;  %v497_v9 = vand.u32 2147483647, %v472_v63  ;;  %vm493_vm8 = vweird.f32 %v472_v63 }
 0x4bb   :  { %2340 = vpow2.f32 %v309_v20 }
 0x4bc   :  { %v500_v14 = vor.u32 1.1754944e-38, %v499_v7  ;;  %vm498_vm10 = vcmp.eq.f32.partialorder %v497_v9, 8.507059e+37 }
 0x4bf   :  { %v424_v1 = vpop.f32.mrf.mxu0 }
 0x4c0   :  { %v2339_v2 = vpop.eup %2338  ;;  %v455_v3 = vsel %vm247_vm2, %v424_v1, -inf }
 0x4c1   :  { %v489_v4 = vmul.f32 %v2339_v2, %v472_v63  ;;  %456 = vmax.xlane.f32.xlu1 %v455_v3  ;;  %vm494_vm7 = vweird.f32 %v2339_v2  ;;  %v2341_v26 = vpop.eup %2340 }
 0x4c2   :  { %vm495_vm9 = vmor %vm493_vm8, %vm494_vm7  ;;  %v314_v27 = vsel %vm247_vm2, %v2341_v26, 0.0 }
 0x4c3   :  { %v490_v5 = vsub.f32 1.0, %v489_v4 }
 0x4c5   :  { %v491_v8 = vmul.f32 %v2339_v2, %v490_v5 }
 0x4c7   :  { %v492_v12 = vadd.f32 %v2339_v2, %v491_v8  ;;  %v580_v13 = vpop.f32.mrf.mxu0 }
 0x4c8   :  { %v611_v16 = vsel %vm247_vm2, %v580_v13, -inf }
 0x4c9   :  { %v496_v17 = vsel %vm495_vm9, %v2339_v2, %v492_v12  ;;  %612 = vmax.xlane.f32.xlu0 %v611_v16 }
 0x4ca   :  { %v501_v19 = vsel %vm498_vm10, %v500_v14, %v496_v17 }
 0x4cb   :  { %v502_v22 = vmul.f32 %v2337_v58, %v501_v19 }
 0x4cd   :  { %2194 = vmatmul.msk.f32.vlgmr.msrb.gmra.mxu2 %vm247_vm2, %v502_v22 }
 0x4cf   :  { %v736_v23 = vpop.f32.mrf.mxu0 }
 0x4d0   :  { %v767_v24 = vsel %vm247_vm2, %v736_v23, -inf }
 0x4d1   :  { %v586_v25 = vpop.permute.xlu1 %585  ;;  %768 = vmax.xlane.f32.xlu2 %v767_v24 }
 0x4d2   :  { %2197 = vmatpush.xpose.msk.msra.mxu2 %vm247_vm2, %v586_v25 }
 0x4d5   :  { %2198 = vmatmul.msk.f32.vlgmr.msra.gmra.mxu2 %vm247_vm2, %v584_v62 }
 0x4d6   :  { %2203 = vmatpush.xpose.msk.msrb.mxu2 %vm247_vm2, %v742_v0 }
 0x4d9   :  { %315 = vadd.xlane.f32.xlu2 %v314_v27 }
 0x4dd   :  { %2204 = vmatmul.msk.f32.vlgmr.msrb.gmra.mxu2 %vm247_vm2, %v740_v28 }
 0x4f1   :  { %373 = vrot.lane.b32.xlu2 %v2798_v21, %s2634_s8 }
 0x534   :  { %v457_v29 = vpop.xlane.xlu1 %456 }
 0x535   :  { %v461_v30 = vsub.f32 %v424_v1, %v457_v29 }
 0x537   :  { %v463_v31 = vmul.f32 1.442695, %v461_v30 }
 0x539   :  { %2342 = vpow2.f32 %v463_v31 }
 0x53c   :  { %v613_v32 = vpop.xlane.xlu0 %612 }
 0x53d   :  { %v617_v33 = vsub.f32 %v580_v13, %v613_v32 }
 0x53f   :  { %v2860_v34 = vpop.eup %2342  ;;  %v619_v35 = vmul.f32 1.442695, %v617_v33 }
 0x540   :  { %v467_v36 = vsel %vm247_vm2, %v2860_v34, 0.0 }
 0x541   :  { %2344 = vpow2.f32 %v619_v35  ;;  %468 = vadd.xlane.f32.xlu1 %v467_v36 }
 0x544   :  { %v769_v37 = vpop.xlane.xlu2 %768 }
 0x545   :  { %v773_v41 = vsub.f32 %v736_v23, %v769_v37 }
 0x547   :  { %v2864_v38 = vpop.eup %2344  ;;  %v775_v44 = vmul.f32 1.442695, %v773_v41 }
 0x548   :  { %v623_v39 = vsel %vm247_vm2, %v2864_v38, 0.0 }
 0x549   :  { %624 = vadd.xlane.f32.xlu0 %v623_v39 }
 0x54c   :  { %v316_v40 = vpop.xlane.xlu2 %315 }
 0x54d   :  { %2346 = vrcp.f32 %v316_v40  ;;  %v343_v49 = vand.u32 2147483648, %v316_v40  ;;  %v341_v51 = vand.u32 2147483647, %v316_v40  ;;  %vm337_vm12 = vweird.f32 %v316_v40 }
 0x54e   :  { %2348 = vpow2.f32 %v775_v44 }
 0x54f   :  { %v344_v55 = vor.u32 1.1754944e-38, %v343_v49  ;;  %vm342_vm14 = vcmp.eq.f32.partialorder %v341_v51, 8.507059e+37 }
 0x550   :  { %v2868_v42 = vpop.f32.mrf.mxu2 }
 0x553   :  { %v2347_v43 = vpop.eup %2346 }
 0x554   :  { %v333_v45 = vmul.f32 %v2347_v43, %v316_v40  ;;  %v374_v46 = vpop.permute.xlu2 %373  ;;  %vm338_vm11 = vweird.f32 %v2347_v43  ;;  %v2871_v58 = vpop.eup %2348 }
 0x555   :  { %394 = vmatpush.msrb.mxu3 %v374_v46  ;;  %vm339_vm13 = vmor %vm337_vm12, %vm338_vm11  ;;  %v779_v61 = vsel %vm247_vm2, %v2871_v58, 0.0 }
 0x556   :  { %v334_v47 = vsub.f32 1.0, %v333_v45 }
 0x558   :  { %v335_v50 = vmul.f32 %v2347_v43, %v334_v47  ;;  %v608_v52 = vpop.f32.mrf.mxu2 }
 0x559   :  { %v614_v53 = vsel %vm247_vm2, %v608_v52, -inf }
 0x55a   :  { %v336_v54 = vadd.f32 %v2347_v43, %v335_v50  ;;  %615 = vmax.xlane.f32.xlu1 %v614_v53 }
 0x55c   :  { %v340_v56 = vsel %vm339_vm13, %v2347_v43, %v336_v54 }
 0x55d   :  { %v345_v57 = vsel %vm342_vm14, %v344_v55, %v340_v56 }
 0x55e   :  { %v346_v59 = vmul.f32 %v2341_v26, %v345_v57 }
 0x560   :  { %2188 = vmatmul.msk.f32.vlgmr.msrb.gmra.mxu3 %vm247_vm2, %v346_v59  ;;  %v764_v60 = vpop.f32.mrf.mxu2 }
 0x561   :  { %v770_v62 = vsel %vm247_vm2, %v764_v60, -inf }
 0x562   :  { %780 = vadd.xlane.f32.xlu1 %v779_v61  ;;  %771 = vmax.xlane.f32.xlu0 %v770_v62 }
 0x576   :  { %503 = vrot.lane.b32.xlu0 %v2787_v15, %s3352_s30 }
 0x57e   :  { %815 = vrot.lane.b32.xlu0 %v2787_v15, %s2636_s1 }
 0x586   :  { %685 = vrot.lane.b32.xlu0 %v2798_v21, %s2637_s20 }
 0x58e   :  { %841 = vrot.lane.b32.xlu0 %v2798_v21, %s2636_s1 }
 0x5b4   :  { %v469_v63 = vpop.xlane.xlu1 %468 }
 0x5b5   :  { %2350 = vrcp.f32 %v469_v63  ;;  %v484_v14 = vand.u32 2147483648, %v469_v63  ;;  %vm478_vm3 = vweird.f32 %v469_v63  ;;  %v482_v16 = vand.u32 2147483647, %v469_v63 }
 0x5b7   :  { %v485_v22 = vor.u32 1.1754944e-38, %v484_v14  ;;  %vm483_vm5 = vcmp.eq.f32.partialorder %v482_v16, 8.507059e+37 }
 0x5bb   :  { %v2351_v3 = vpop.eup %2350 }
 0x5bc   :  { %v2885_v0 = vpop.xlane.xlu0 %624  ;;  %v474_v5 = vmul.f32 %v2351_v3, %v469_v63  ;;  %vm479_vm15 = vweird.f32 %v2351_v3 }
 0x5bd   :  { %vm480_vm4 = vmor %vm478_vm3, %vm479_vm15  ;;  %v640_v49 = vand.u32 2147483648, %v2885_v0  ;;  %vm634_vm10 = vweird.f32 %v2885_v0 }
 0x5be   :  { %v475_v7 = vsub.f32 1.0, %v474_v5 }
 0x5c0   :  { %v476_v21 = vmul.f32 %v2351_v3, %v475_v7 }
 0x5c2   :  { %v477_v13 = vadd.f32 %v2351_v3, %v476_v21 }
 0x5c4   :  { %v481_v19 = vsel %vm480_vm4, %v2351_v3, %v477_v13 }
 0x5c5   :  { %v486_v23 = vsel %vm483_vm5, %v485_v22, %v481_v19 }
 0x5c6   :  { %v487_v25 = vmul.f32 %v2860_v34, %v486_v23 }
 0x5cd   :  { %v616_v1 = vpop.xlane.xlu1 %615 }
 0x5ce   :  { %v618_v2 = vsub.f32 %v608_v52, %v616_v1  ;;  %v638_v52 = vand.u32 2147483647, %v2885_v0 }
 0x5d0   :  { %v621_v4 = vmul.f32 1.442695, %v618_v2  ;;  %vm639_vm13 = vcmp.eq.f32.partialorder %v638_v52, 8.507059e+37 }
 0x5d2   :  { %2352 = vpow2.f32 %v621_v4 }
 0x5d5   :  { %v772_v6 = vpop.xlane.xlu0 %771  ;;  %v2901_v29 = vpop.xlane.xlu1 %780 }
 0x5d6   :  { %v774_v8 = vsub.f32 %v764_v60, %v772_v6  ;;  %v641_v60 = vor.u32 1.1754944e-38, %v640_v49  ;;  %v796_v3 = vand.u32 2147483648, %v2901_v29  ;;  %vm790_vm4 = vweird.f32 %v2901_v29 }
 0x5d7   :  { %v794_v5 = vand.u32 2147483647, %v2901_v29 }
 0x5d8   :  { %v2887_v9 = vpop.eup %2352  ;;  %v777_v10 = vmul.f32 1.442695, %v774_v8  ;;  %v797_v13 = vor.u32 1.1754944e-38, %v796_v3  ;;  %v1000_v3 = vld [vmem:[%s3338_s10] sm:$0xff] }
 0x5d9   :  { %v626_v12 = vsel %vm247_vm2, %v2887_v9, 0.0 }
 0x5da   :  { %627 = vadd.xlane.f32.xlu1 %v626_v12  ;;  %2354 = vpow2.f32 %v777_v10 }
 0x5db   :  { %2356 = vrcp.f32 %v2885_v0 }
 0x5dc   :  { %2358 = vrcp.f32 %v2901_v29 }
 0x5e0   :  { %v2891_v17 = vpop.eup %2354 }
 0x5e1   :  { %v782_v20 = vsel %vm247_vm2, %v2891_v17, 0.0  ;;  %v2357_v30 = vpop.eup %2356 }
 0x5e2   :  { %783 = vadd.xlane.f32.xlu2 %v782_v20  ;;  %v630_v32 = vmul.f32 %v2357_v30, %v2885_v0  ;;  %v2906_v33 = vpop.eup %2358  ;;  %vm635_vm7 = vweird.f32 %v2357_v30 }
 0x5e3   :  { %v786_v39 = vmul.f32 %v2906_v33, %v2901_v29  ;;  %vm636_vm12 = vmor %vm634_vm10, %vm635_vm7  ;;  %vm791_vm15 = vweird.f32 %v2906_v33  ;;  %v396_v6 = vpop.f32.mrf.mxu3 }
 0x5e4   :  { %v631_v34 = vsub.f32 1.0, %v630_v32 }
 0x5e5   :  { %v787_v46 = vsub.f32 1.0, %v786_v39 }
 0x5e6   :  { %v632_v37 = vmul.f32 %v2357_v30, %v631_v34 }
 0x5e7   :  { %v788_v57 = vmul.f32 %v2906_v33, %v787_v46 }
 0x5e8   :  { %v504_v24 = vpop.permute.xlu0 %503  ;;  %v633_v45 = vadd.f32 %v2357_v30, %v632_v37 }
 0x5e9   :  { %524 = vmatpush.msra.mxu3 %v504_v24  ;;  %v789_v2 = vadd.f32 %v2906_v33, %v788_v57  ;;  %v900_v24 = vld [vmem:[%s3334_s6 + $0x10] sm:$0xff] }
 0x5ea   :  { %2193 = vmatmul.msk.f32.vlgmr.msra.gmra.mxu3 %vm247_vm2, %v487_v25  ;;  %v637_v56 = vsel %vm636_vm12, %v2357_v30, %v633_v45  ;;  %v899_v25 = vld [vmem:[%s3334_s6 + $0x8] sm:$0xff] }
 0x5eb   :  { %v642_v63 = vsel %vm639_vm13, %v641_v60, %v637_v56 }
 0x5f0   :  { %v2897_v26 = vpop.permute.xlu0 %815 }
 0x5f3   :  { %659 = vrot.lane.b32.xlu1 %v2787_v15, %s2637_s20 }
 0x5f8   :  { %v686_v27 = vpop.permute.xlu0 %685 }
 0x5f9   :  { %706 = vmatpush.msrb.mxu1 %v686_v27 }
 0x600   :  { %v842_v28 = vpop.permute.xlu0 %841 }
 0x601   :  { %862 = vmatpush.msra.mxu1 %v842_v28 }
 0x64d   :  { %v628_v31 = vpop.xlane.xlu1 %627 }
 0x64e   :  { %2360 = vrcp.f32 %v628_v31  ;;  %v655_v41 = vand.u32 2147483648, %v628_v31  ;;  %v653_v44 = vand.u32 2147483647, %v628_v31  ;;  %vm649_vm8 = vweird.f32 %v628_v31 }
 0x650   :  { %v656_v50 = vor.u32 1.1754944e-38, %v655_v41  ;;  %vm654_vm11 = vcmp.eq.f32.partialorder %v653_v44, 8.507059e+37 }
 0x654   :  { %v2361_v35 = vpop.eup %2360 }
 0x655   :  { %v645_v15 = vmul.f32 %v2361_v35, %v628_v31  ;;  %v784_v36 = vpop.xlane.xlu2 %783  ;;  %vm650_vm6 = vweird.f32 %v2361_v35 }
 0x656   :  { %2362 = vrcp.f32 %v784_v36  ;;  %vm651_vm9 = vmor %vm649_vm8, %vm650_vm6  ;;  %v811_v62 = vand.u32 2147483648, %v784_v36  ;;  %v809_v0 = vand.u32 2147483647, %v784_v36  ;;  %vm805_vm3 = vweird.f32 %v784_v36 }
 0x657   :  { %v646_v40 = vsub.f32 1.0, %v645_v15  ;;  %vm792_vm6 = vmor %vm790_vm4, %vm791_vm15  ;;  %vm795_vm8 = vcmp.eq.f32.partialorder %v794_v5, 8.507059e+37  ;;  %vm1051_vm4 = vcmask 523264  }
 0x658   :  { %v812_v7 = vor.u32 1.1754944e-38, %v811_v62  ;;  %vm810_vm7 = vcmp.eq.f32.partialorder %v809_v0, 8.507059e+37  ;;  %v793_v12 = vsel %vm792_vm6, %v2906_v33, %v789_v2  ;;  %v1002_v0 = vld [vmem:[%s3338_s10 + $0x10] sm:$0xff]  ;;  %v1001_v2 = vld [vmem:[%s3338_s10 + $0x8] sm:$0xff] }
 0x659   :  { %v647_v43 = vmul.f32 %v2361_v35, %v646_v40  ;;  %v798_v16 = vsel %vm795_vm8, %v797_v13, %v793_v12 }
 0x65b   :  { %v648_v47 = vadd.f32 %v2361_v35, %v647_v43 }
 0x65c   :  { %v2363_v51 = vpop.eup %2362 }
 0x65d   :  { %v652_v53 = vsel %vm651_vm9, %v2361_v35, %v648_v47  ;;  %v801_v54 = vmul.f32 %v2363_v51, %v784_v36  ;;  %vm806_vm14 = vweird.f32 %v2363_v51  ;;  %vm895_vm9 = vcmask 195584  }
 0x65e   :  { %v657_v55 = vsel %vm654_vm11, %v656_v50, %v652_v53  ;;  %vm807_vm5 = vmor %vm805_vm3, %vm806_vm14  ;;  %v2639_v47 = vmov 32.0  }
 0x65f   :  { %v658_v59 = vmul.f32 %v2887_v9, %v657_v55  ;;  %v802_v61 = vsub.f32 1.0, %v801_v54  ;;  %v643_v9 = vmul.f32 %v2864_v38, %v642_v63  ;;  %v799_v38 = vmul.f32 %v2871_v58, %v798_v16  ;;  %v901_v58 = vld [vmem:[%s3334_s6 + $0x18] sm:$0xff] }
 0x660   :  { %924 = vmatpush.msra.mxu0 %v901_v58  ;;  %2364 = vrcp.f32 %v2639_v47  ;;  %v2317_v58 = vld [vmem:[#allocation10] ss:$0 sm:$0xff]  ;;  %v2320_v47 = vld [vmem:[%s3341_s13] ss:$0 sm:$0xff] }
 0x661   :  { %2200 = vmatmul.msk.f32.vlgmr.msrb.gmra.mxu1 %vm247_vm2, %v658_v59  ;;  %v803_v1 = vmul.f32 %v2363_v51, %v802_v61 }
 0x662   :  { %925 = vmatpush.msra.mxu0 %v900_v24 }
 0x663   :  { %v804_v4 = vadd.f32 %v2363_v51, %v803_v1  ;;  %v1003_v1 = vld [vmem:[%s3338_s10 + $0x18] sm:$0xff] }
 0x664   :  { %926 = vmatpush.msra.mxu0 %v899_v25  ;;  %1026 = vmatpush.msra.mxu2 %v1003_v1 }
 0x665   :  { %v660_v8 = vpop.permute.xlu1 %659  ;;  %v808_v10 = vsel %vm807_vm5, %v2363_v51, %v804_v4 }
 0x666   :  { %680 = vmatpush.msrb.mxu3 %v660_v8  ;;  %v813_v21 = vsel %vm810_vm7, %v812_v7, %v808_v10  ;;  %v2365_v49 = vpop.eup %2364  ;;  %1027 = vmatpush.msra.mxu2 %v1002_v0  ;;  %v1046_v7 = vld [vmem:[%s3340_s12 + $0x38] sm:$0xff]  ;;  %v1045_v8 = vld [vmem:[%s3340_s12 + $0x30] sm:$0xff] }
 0x667   :  { %2199 = vmatmul.msk.f32.vlgmr.msrb.gmra.mxu3 %vm247_vm2, %v643_v9  ;;  %v814_v14 = vmul.f32 %v2891_v17, %v813_v21  ;;  %v946_v50 = vmul.f32 32.0, %v2365_v49  ;;  %vm950_vm10 = vweird.f32 %v2365_v49  ;;  %v1044_v9 = vld [vmem:[%s3340_s12 + $0x28] sm:$0xff]  ;;  %v1043_v21 = vld [vmem:[%s3340_s12 + $0x20] sm:$0xff] }
 0x668   :  { %836 = vmatpush.msra.mxu3 %v2897_v26  ;;  %1028 = vmatpush.msra.mxu2 %v1001_v2 }
 0x669   :  { %2206 = vmatmul.msk.f32.vlgmr.msra.gmra.mxu1 %vm247_vm2, %v814_v14  ;;  %v947_v51 = vsub.f32 1.0, %v946_v50 }
 0x66a   :  { %1029 = vmatpush.msra.mxu2 %v1000_v3  ;;  %1066 = vmatpush.msrb.mxu3 %v1046_v7  ;;  %v2216_v3 = vld [vmem:[%s3332_s4 + $0x38] sm:$0xff] }
 0x66b   :  { %v948_v52 = vmul.f32 %v2365_v49, %v947_v51  ;;  %1167 = vmatpush.msrb.mxu1 %v2216_v3 }
 0x66c   :  { %1067 = vmatpush.msrb.mxu3 %v1045_v8 }
 0x66d   :  { %v526_v19 = vpop.f32.mrf.mxu3  ;;  %v949_v53 = vadd.f32 %v2365_v49, %v948_v52 }
 0x66e   :  { %869 = vrot.lane.b32.xlu1 %v526_v19, %s3350_s14  ;;  %1068 = vmatpush.msrb.mxu3 %v1044_v9  ;;  %v1042_v19 = vld [vmem:[%s3340_s12 + $0x18] sm:$0xff] }
 0x66f   :  { %2205 = vmatmul.msk.f32.vlgmr.msra.gmra.mxu3 %vm247_vm2, %v799_v38  ;;  %v2964_v54 = vsel %vm950_vm10, %v2365_v49, %v949_v53 }
 0x670   :  { %1069 = vmatpush.msrb.mxu3 %v1043_v21 }
 0x672   :  { %1070 = vmatpush.msrb.mxu3 %v1042_v19 }
 0x6de   :  { %v708_v20 = vpop.f32.mrf.mxu1 }
 0x6e0   :  { %v870_v26 = vpop.permute.xlu1 %869 }
 0x6e1   :  { %v891_v28 = vsel %vm247_vm2, %v2830_v48, %v870_v26  ;;  %v2316_v48 = vld [vmem:[%s3335_s7] ss:$0 sm:$0xff] }
 0x6e6   :  { %v864_v22 = vpop.f32.mrf.mxu1 }
 0x6e7   :  { %887 = vrot.lane.b32.xlu2 %v864_v22, %s2638_s2 }
 0x6ea   :  { %v682_v23 = vpop.f32.mrf.mxu3 }
 0x6eb   :  { %877 = vrot.lane.b32.xlu0 %v682_v23, %s3360_s19 }
 0x6f2   :  { %v838_v17 = vpop.f32.mrf.mxu3 }
 0x6f3   :  { %871 = vrot.lane.b32.xlu0 %v2868_v42, %s3350_s14  ;;  %885 = vrot.lane.b32.xlu1 %v838_v17, %s2638_s2  ;;  %v898_v42 = vld [vmem:[%s3334_s6] sm:$0xff] }
 0x6f4   :  { %927 = vmatpush.msra.mxu0 %v898_v42 }
 0x6fb   :  { %879 = vrot.lane.b32.xlu1 %v708_v20, %s3360_s19 }
 0x741   :  { %v888_v35 = vpop.permute.xlu2 %887 }
 0x75d   :  { %v878_v27 = vpop.permute.xlu0 %877 }
 0x75e   :  { %v893_v29 = vsel %vm173_vm0, %v891_v28, %v878_v27  ;;  %v2318_v27 = vld [vmem:[%s3337_s9] ss:$0 sm:$0xff] }
 0x765   :  { %v886_v30 = vpop.permute.xlu1 %885  ;;  %v872_v32 = vpop.permute.xlu0 %871 }
 0x766   :  { %v896_v31 = vsel %vm895_vm9, %v893_v29, %v886_v30  ;;  %v892_v33 = vsel %vm247_vm2, %v396_v6, %v872_v32 }
 0x767   :  { %2207 = vmatmul.msk.f32.vlgmr.msra.gmra.mxu0 %vm214_vm1, %v896_v31 }
 0x76d   :  { %v880_v34 = vpop.permute.xlu1 %879 }
 0x76e   :  { %v894_v15 = vsel %vm173_vm0, %v892_v33, %v880_v34 }
 0x76f   :  { %v897_v36 = vsel %vm895_vm9, %v894_v15, %v888_v35 }
 0x770   :  { %2208 = vmatmul.msk.f32.gmra.mxu0 %vm214_vm1, %v897_v36  ;;  %v1041_v36 = vld [vmem:[%s3340_s12 + $0x10] sm:$0xff] }
 0x771   :  { %1071 = vmatpush.msrb.mxu3 %v1041_v36 }
 0x7e4   :  { %v929_v37 = vpop.f32.mrf.mxu0 }
 0x7e5   :  { %v930_v39 = vadd.f32 %v2316_v48, %v929_v37  ;;  %v1039_v37 = vld [vmem:[%s3340_s12] sm:$0xff] }
 0x7e7   :  { %v935_v40 = vadd.f32 %v930_v39, %v2779_v11  ;;  %v2319_v39 = vld [vmem:[%s3339_s11] ss:$0 sm:$0xff] }
 0x7e9   :  { %v939_v41 = vsel %vm214_vm1, %v935_v40, 0.0 }
 0x7ea   :  { %940 = vadd.xlane.f32.xlu0 %v939_v41 }
 0x7ed   :  { %v932_v43 = vpop.f32.mrf.mxu0 }
 0x7ee   :  { %v933_v44 = vadd.f32 %v2316_v48, %v932_v43  ;;  %v1040_v48 = vld [vmem:[%s3340_s12 + $0x8] sm:$0xff] }
 0x7ef   :  { %1072 = vmatpush.msrb.mxu3 %v1040_v48 }
 0x7f0   :  { %v936_v45 = vadd.f32 %v933_v44, %v2791_v18 }
 0x7f1   :  { %1073 = vmatpush.msrb.mxu3 %v1039_v37 }
 0x7f2   :  { %v942_v46 = vsel %vm214_vm1, %v936_v45, 0.0 }
 0x7f3   :  { %943 = vadd.xlane.f32.xlu1 %v942_v46 }
 0x85d   :  { %v941_v11 = vpop.xlane.xlu0 %940 }
 0x85e   :  { %v952_v55 = vmul.f32 %v2964_v54, %v941_v11 }
 0x860   :  { %v954_v56 = vsub.f32 %v935_v40, %v952_v55 }
 0x862   :  { %v956_v57 = vmul.f32 %v954_v56, %v954_v56 }
 0x864   :  { %v958_v18 = vsel %vm214_vm1, %v956_v57, 0.0 }
 0x865   :  { %959 = vadd.xlane.f32.xlu2 %v958_v18 }
 0x866   :  { %v944_v59 = vpop.xlane.xlu1 %943 }
 0x867   :  { %v953_v60 = vmul.f32 %v2964_v54, %v944_v59 }
 0x869   :  { %v955_v61 = vsub.f32 %v936_v45, %v953_v60 }
 0x86b   :  { %v957_v62 = vmul.f32 %v955_v61, %v955_v61 }
 0x86d   :  { %v961_v63 = vsel %vm214_vm1, %v957_v62, 0.0 }
 0x86e   :  { %962 = vadd.xlane.f32.xlu0 %v961_v63 }
 0x8d8   :  { %v960_v4 = vpop.xlane.xlu2 %959 }
 0x8d9   :  { %v964_v5 = vmul.f32 %v960_v4, %v2964_v54  ;;  %v2215_v4 = vld [vmem:[%s3332_s4 + $0x30] sm:$0xff] }
 0x8da   :  { %1168 = vmatpush.msrb.mxu1 %v2215_v4 }
 0x8db   :  { %v966_v6 = vadd.f32 1e-05, %v964_v5  ;;  %v2214_v5 = vld [vmem:[%s3332_s4 + $0x28] sm:$0xff] }
 0x8dc   :  { %1169 = vmatpush.msrb.mxu1 %v2214_v5 }
 0x8dd   :  { %2366 = vrsqrt.f32 %v966_v6  ;;  %vm974_vm12 = vweird.f32 %v966_v6 }
 0x8e1   :  { %v963_v10 = vpop.xlane.xlu0 %962 }
 0x8e2   :  { %v965_v12 = vmul.f32 %v963_v10, %v2964_v54 }
 0x8e3   :  { %v2367_v13 = vpop.eup %2366 }
 0x8e4   :  { %v969_v14 = vmul.f32 %v2367_v13, %v966_v6  ;;  %v967_v16 = vadd.f32 1e-05, %v965_v12  ;;  %vm975_vm11 = vweird.f32 %v2367_v13  ;;  %v2213_v6 = vld [vmem:[%s3332_s4 + $0x20] sm:$0xff]  ;;  %s2161_s4 = sshll.u32 %s2640_s29, 4  ;;  %s2162_s4 = int_to_ptr.vmem [resolvable:$true] %s2161_s4 }
 0x8e5   :  { %vm976_vm13 = vmor %vm974_vm12, %vm975_vm11  ;;  %1170 = vmatpush.msrb.mxu1 %v2213_v6  ;;  %vm1234_vm12 = vcmask 57344  }
 0x8e6   :  { %v970_v38 = vmul.f32 %v2367_v13, %v969_v14  ;;  %2368 = vrsqrt.f32 %v967_v16  ;;  %vm984_vm15 = vweird.f32 %v967_v16 }
 0x8e8   :  { %v971_v20 = vmul.f32 0.5, %v970_v38 }
 0x8ea   :  { %v972_v22 = vsub.f32 1.5, %v971_v20 }
 0x8ec   :  { %v2369_v23 = vpop.eup %2368  ;;  %v973_v17 = vmul.f32 %v2367_v13, %v972_v22 }
 0x8ed   :  { %v979_v24 = vmul.f32 %v2369_v23, %v967_v16  ;;  %vm985_vm14 = vweird.f32 %v2369_v23 }
 0x8ee   :  { %v977_v25 = vsel %vm976_vm13, %v2367_v13, %v973_v17  ;;  %vm986_vm3 = vmor %vm984_vm15, %vm985_vm14 }
 0x8ef   :  { %v988_v42 = vmul.f32 %v977_v25, %v954_v56  ;;  %v980_v26 = vmul.f32 %v2369_v23, %v979_v24 }
 0x8f1   :  { %v993_v28 = vmul.f32 %v2317_v58, %v988_v42  ;;  %v981_v29 = vmul.f32 0.5, %v980_v26  ;;  %v2322_v42 = vld [vmem:[%s3343_s15] ss:$0 sm:$0xff] }
 0x8f3   :  { %v982_v30 = vsub.f32 1.5, %v981_v29  ;;  %v998_v31 = vadd.f32 %v2318_v27, %v993_v28 }
 0x8f5   :  { %v983_v32 = vmul.f32 %v2369_v23, %v982_v30  ;;  %2209 = vmatmul.msk.f32.vlgmr.msra.gmra.mxu2 %vm214_vm1, %v998_v31 }
 0x8f7   :  { %v987_v33 = vsel %vm986_vm3, %v2369_v23, %v983_v32  ;;  %v2321_v23 = vld [vmem:[#allocation11] ss:$0 sm:$0xff] }
 0x8f8   :  { %v989_v34 = vmul.f32 %v987_v33, %v955_v61 }
 0x8fa   :  { %v994_v35 = vmul.f32 %v2317_v58, %v989_v34 }
 0x8fc   :  { %v999_v15 = vadd.f32 %v2318_v27, %v994_v35  ;;  %v2323_v35 = vld [vmem:[%s3333_s5 + $0x1] ss:$0 sm:$0xff]  ;;  %s3361_s5 = smov 56  }
 0x8fe   :  { %2210 = vmatmul.msk.f32.gmra.mxu2 %vm214_vm1, %v999_v15 }
 0x978   :  { %v1031_v40 = vpop.f32.mrf.mxu2 }
 0x979   :  { %v1032_v41 = vadd.f32 %v2319_v39, %v1031_v40 }
 0x97b   :  { %v1037_v43 = vmax.f32 %v1032_v41, 0.0 }
 0x97d   :  { %2211 = vmatmul.msk.f32.vlgmr.msrb.gmra.mxu3 %vm1051_vm4, %v1037_v43 }
 0x981   :  { %v1034_v44 = vpop.f32.mrf.mxu2 }
 0x982   :  { %v1035_v45 = vadd.f32 %v2319_v39, %v1034_v44 }
 0x984   :  { %v1038_v46 = vmax.f32 %v1035_v45, 0.0 }
 0x986   :  { %2212 = vmatmul.msk.f32.gmra.mxu3 %vm1051_vm4, %v1038_v46 }
 0xa00   :  { %v1075_v49 = vpop.f32.mrf.mxu3 }
 0xa01   :  { %v1076_v50 = vadd.f32 %v2320_v47, %v1075_v49 }
 0xa03   :  { %v1081_v51 = vadd.f32 %v1076_v50, %v998_v31 }
 0xa05   :  { %v1085_v52 = vsel %vm214_vm1, %v1081_v51, 0.0 }
 0xa06   :  { %1086 = vadd.xlane.f32.xlu1 %v1085_v52 }
 0xa09   :  { %v1078_v53 = vpop.f32.mrf.mxu3 }
 0xa0a   :  { %v1079_v11 = vadd.f32 %v2320_v47, %v1078_v53 }
 0xa0c   :  { %v1082_v55 = vadd.f32 %v1079_v11, %v999_v15 }
 0xa0e   :  { %v1088_v56 = vsel %vm214_vm1, %v1082_v55, 0.0 }
 0xa0f   :  { %1089 = vadd.xlane.f32.xlu0 %v1088_v56 }
 0xa79   :  { %v1087_v57 = vpop.xlane.xlu1 %1086 }
 0xa7a   :  { %v1091_v18 = vmul.f32 %v1087_v57, %v2964_v54 }
 0xa7c   :  { %v1093_v59 = vsub.f32 %v1081_v51, %v1091_v18 }
 0xa7e   :  { %v1095_v60 = vmul.f32 %v1093_v59, %v1093_v59 }
 0xa80   :  { %v1097_v61 = vsel %vm214_vm1, %v1095_v60, 0.0 }
 0xa81   :  { %1098 = vadd.xlane.f32.xlu1 %v1097_v61 }
 0xa82   :  { %v1090_v62 = vpop.xlane.xlu0 %1089 }
 0xa83   :  { %v1092_v63 = vmul.f32 %v1090_v62, %v2964_v54 }
 0xa85   :  { %v1094_v1 = vsub.f32 %v1082_v55, %v1092_v63 }
 0xa87   :  { %v1096_v0 = vmul.f32 %v1094_v1, %v1094_v1 }
 0xa89   :  { %v1100_v2 = vsel %vm214_vm1, %v1096_v0, 0.0 }
 0xa8a   :  { %1101 = vadd.xlane.f32.xlu0 %v1100_v2 }
 0xaf4   :  { %v1099_v7 = vpop.xlane.xlu1 %1098 }
 0xaf5   :  { %v1103_v8 = vmul.f32 %v1099_v7, %v2964_v54 }
 0xaf7   :  { %v1105_v9 = vadd.f32 1e-05, %v1103_v8 }
 0xaf9   :  { %2370 = vrsqrt.f32 %v1105_v9  ;;  %vm1113_vm6 = vweird.f32 %v1105_v9 }
 0xafd   :  { %v1102_v10 = vpop.xlane.xlu0 %1101 }
 0xafe   :  { %v1104_v12 = vmul.f32 %v1102_v10, %v2964_v54 }
 0xaff   :  { %v2371_v21 = vpop.eup %2370 }
 0xb00   :  { %v1108_v13 = vmul.f32 %v2371_v21, %v1105_v9  ;;  %v1106_v14 = vadd.f32 1e-05, %v1104_v12  ;;  %vm1114_vm5 = vweird.f32 %v2371_v21 }
 0xb01   :  { %vm1115_vm7 = vmor %vm1113_vm6, %vm1114_vm5 }
 0xb02   :  { %v1109_v16 = vmul.f32 %v2371_v21, %v1108_v13  ;;  %2372 = vrsqrt.f32 %v1106_v14  ;;  %vm1123_vm10 = vweird.f32 %v1106_v14 }
 0xb04   :  { %v1110_v19 = vmul.f32 0.5, %v1109_v16 }
 0xb06   :  { %v1111_v38 = vsub.f32 1.5, %v1110_v19 }
 0xb08   :  { %v2373_v20 = vpop.eup %2372  ;;  %v1112_v22 = vmul.f32 %v2371_v21, %v1111_v38 }
 0xb09   :  { %v1118_v17 = vmul.f32 %v2373_v20, %v1106_v14  ;;  %vm1124_vm8 = vweird.f32 %v2373_v20 }
 0xb0a   :  { %v1116_v58 = vsel %vm1115_vm7, %v2371_v21, %v1112_v22  ;;  %vm1125_vm11 = vmor %vm1123_vm10, %vm1124_vm8 }
 0xb0b   :  { %v1127_v24 = vmul.f32 %v1116_v58, %v1093_v59  ;;  %v1119_v25 = vmul.f32 %v2373_v20, %v1118_v17 }
 0xb0d   :  { %v1132_v26 = vmul.f32 %v2321_v23, %v1127_v24  ;;  %v1120_v27 = vmul.f32 0.5, %v1119_v25 }
 0xb0f   :  { %v1121_v28 = vsub.f32 1.5, %v1120_v27  ;;  %v3044_v29 = vadd.f32 %v2322_v42, %v1132_v26 }
 0xb11   :  { %v1122_v30 = vmul.f32 %v2373_v20, %v1121_v28  ;;  %2218 = vmatmul.msk.f32.vlgmr.msrb.gmra.mxu1 %vm214_vm1, %v3044_v29 }
 0xb13   :  { %v1126_v31 = vsel %vm1125_vm11, %v2373_v20, %v1122_v30 }
 0xb14   :  { %v1128_v32 = vmul.f32 %v1126_v31, %v1094_v1 }
 0xb16   :  { %v1133_v33 = vmul.f32 %v2321_v23, %v1128_v32 }
 0xb18   :  { %v3048_v34 = vadd.f32 %v2322_v42, %v1133_v33 }
 0xb1a   :  { %2219 = vmatmul.msk.f32.gmra.mxu1 %vm214_vm1, %v3048_v34 }
 0xb8e   :  { %v1172_v15 = vpop.f32.mrf.mxu1 }
 0xb8f   :  { %v1173_v36 = vadd.f32 %v2323_v35, %v1172_v15 }
 0xb91   :  { %1180 = vrot.lane.b32.xlu2 %v1173_v36, %s2627_s25  ;;  %1337 = vrot.lane.b32.xlu0 %v1173_v36, %s2628_s27  ;;  %v1179_v37 = vrot.slane %v1173_v36, 7 }
 0xb97   :  { %v1175_v48 = vpop.f32.mrf.mxu1 }
 0xb98   :  { %v1176_v39 = vadd.f32 %v2323_v35, %v1175_v48 }
 0xb99   :  { %1335 = vrot.lane.b32.xlu2 %v1179_v37, %s2631_s18 }
 0xb9a   :  { %1365 = vrot.lane.b32.xlu0 %v1176_v39, %s2628_s27  ;;  %1208 = vrot.lane.b32.xlu1 %v1176_v39, %s2627_s25  ;;  %v3060_v40 = vpack.i.bf16 %v1173_v36, %v1176_v39  ;;  %v1207_v41 = vrot.slane %v1176_v39, 7  ;;  %s3366_s25 = smov 8  }
 0xba1   :  { %1519 = vrot.lane.b32.xlu2 %v1207_v41, %s2635_s16 }
 0xba2   :  { %1521 = vrot.lane.b32.xlu0 %v1176_v39, %s2629_s0  ;;  %1363 = vrot.lane.b32.xlu1 %v1207_v41, %s2631_s18 }
 0xba9   :  { %1649 = vrot.lane.b32.xlu2 %v1173_v36, %s2632_s21 }
 0xbaa   :  { %1491 = vrot.lane.b32.xlu0 %v1179_v37, %s2635_s16  ;;  %1493 = vrot.lane.b32.xlu1 %v1173_v36, %s2629_s0 }
 0xbb2   :  { %1675 = vrot.lane.b32.xlu0 %v1207_v41, %s2633_s22  ;;  %1677 = vrot.lane.b32.xlu1 %v1176_v39, %s2632_s21 }
 0xbba   :  { %1647 = vrot.lane.b32.xlu1 %v1179_v37, %s2633_s22 }
 0xbeb   :  { %v1181_v43 = vpop.permute.xlu2 %1180 }
 0xbec   :  { %2220 = vmatpush.xpose.msk.msrb.mxu0 %vm247_vm2, %v1181_v43 }
 0xbef   :  { %2221 = vmatmul.msk.f32.vlgmr.msrb.gmra.mxu0 %vm247_vm2, %v1179_v37 }
 0xbf3   :  { %v1336_v45 = vpop.permute.xlu2 %1335 }
 0xbfb   :  { %v1520_v49 = vpop.permute.xlu2 %1519 }
 0xc03   :  { %v1338_v44 = vpop.permute.xlu0 %1337  ;;  %v1650_v53 = vpop.permute.xlu2 %1649 }
 0xc0c   :  { %v1209_v46 = vpop.permute.xlu1 %1208  ;;  %v1366_v47 = vpop.permute.xlu0 %1365 }
 0xc0d   :  { %2222 = vmatpush.xpose.msk.msrb.mxu2 %vm247_vm2, %v1209_v46  ;;  %2228 = vmatpush.xpose.msk.msra.mxu3 %vm247_vm2, %v1366_v47 }
 0xc10   :  { %2223 = vmatmul.msk.f32.vlgmr.msrb.gmra.mxu2 %vm247_vm2, %v1207_v41 }
 0xc11   :  { %2226 = vmatpush.xpose.msk.msra.mxu2 %vm247_vm2, %v1338_v44 }
 0xc14   :  { %v1364_v50 = vpop.permute.xlu1 %1363  ;;  %v1522_v51 = vpop.permute.xlu0 %1521 }
 0xc15   :  { %2229 = vmatmul.msk.f32.vlgmr.msra.gmra.mxu3 %vm247_vm2, %v1364_v50 }
 0xc16   :  { %2234 = vmatpush.xpose.msk.msrb.mxu3 %vm247_vm2, %v1522_v51 }
 0xc18   :  { %2227 = vmatmul.msk.f32.vlgmr.msra.gmra.mxu2 %vm247_vm2, %v1336_v45 }
 0xc1c   :  { %v1494_v52 = vpop.permute.xlu1 %1493  ;;  %v1492_v11 = vpop.permute.xlu0 %1491 }
 0xc1d   :  { %2232 = vmatpush.xpose.msk.msrb.mxu2 %vm247_vm2, %v1494_v52  ;;  %2235 = vmatmul.msk.f32.vlgmr.msrb.gmra.mxu3 %vm247_vm2, %v1520_v49 }
 0xc20   :  { %2233 = vmatmul.msk.f32.vlgmr.msrb.gmra.mxu2 %vm247_vm2, %v1492_v11 }
 0xc21   :  { %2238 = vmatpush.xpose.msk.msra.mxu2 %vm247_vm2, %v1650_v53 }
 0xc24   :  { %v1678_v55 = vpop.permute.xlu1 %1677  ;;  %v1676_v56 = vpop.permute.xlu0 %1675 }
 0xc25   :  { %2240 = vmatpush.xpose.msk.msra.mxu3 %vm247_vm2, %v1678_v55 }
 0xc28   :  { %2241 = vmatmul.msk.f32.vlgmr.msra.gmra.mxu3 %vm247_vm2, %v1676_v56 }
 0xc2c   :  { %v1648_v57 = vpop.permute.xlu1 %1647 }
 0xc2d   :  { %2239 = vmatmul.msk.f32.vlgmr.msra.gmra.mxu2 %vm247_vm2, %v1648_v57 }
 0xc6c   :  { %v1203_v18 = vpop.f32.mrf.mxu0 }
 0xc6d   :  { %v1235_v59 = vsel %vm1234_vm12, %v1203_v18, -inf }
 0xc6e   :  { %1236 = vmax.xlane.f32.xlu0 %v1235_v59 }
 0xc93   :  { %v1231_v60 = vpop.f32.mrf.mxu2 }
 0xc94   :  { %v1238_v61 = vsel %vm1234_vm12, %v1231_v60, -inf }
 0xc95   :  { %1239 = vmax.xlane.f32.xlu2 %v1238_v61 }
 0xc98   :  { %v1388_v62 = vpop.f32.mrf.mxu3 }
 0xc99   :  { %v1394_v63 = vsel %vm1234_vm12, %v1388_v62, -inf }
 0xc9a   :  { %1395 = vmax.xlane.f32.xlu1 %v1394_v63 }
 0xc9b   :  { %v1360_v1 = vpop.f32.mrf.mxu2 }
 0xc9c   :  { %v1391_v0 = vsel %vm1234_vm12, %v1360_v1, -inf }
 0xc9d   :  { %1392 = vmax.xlane.f32.xlu2 %v1391_v0 }
 0xca0   :  { %v1544_v2 = vpop.f32.mrf.mxu3 }
 0xca1   :  { %v1550_v3 = vsel %vm1234_vm12, %v1544_v2, -inf }
 0xca2   :  { %1551 = vmax.xlane.f32.xlu0 %v1550_v3 }
 0xca3   :  { %v1516_v4 = vpop.f32.mrf.mxu2 }
 0xca4   :  { %v1547_v5 = vsel %vm1234_vm12, %v1516_v4, -inf }
 0xca5   :  { %1548 = vmax.xlane.f32.xlu1 %v1547_v5 }
 0xcab   :  { %v1700_v13 = vpop.f32.mrf.mxu3 }
 0xcac   :  { %v1706_v14 = vsel %vm1234_vm12, %v1700_v13, -inf }
 0xcb0   :  { %v1672_v6 = vpop.f32.mrf.mxu2 }
 0xcb1   :  { %v1703_v7 = vsel %vm1234_vm12, %v1672_v6, -inf }
 0xcb2   :  { %1704 = vmax.xlane.f32.xlu0 %v1703_v7 }
 0xcbe   :  { %2295 = vrot.lane.b32.xlu1 %v3060_v40, %s2634_s8 }
 0xce1   :  { %v1237_v8 = vpop.xlane.xlu0 %1236 }
 0xce2   :  { %v1241_v9 = vsub.f32 %v1203_v18, %v1237_v8 }
 0xce4   :  { %v1243_v10 = vmul.f32 1.442695, %v1241_v9 }
 0xce6   :  { %2374 = vpow2.f32 %v1243_v10 }
 0xcec   :  { %v3096_v12 = vpop.eup %2374 }
 0xced   :  { %v1247_v21 = vsel %vm1234_vm12, %v3096_v12, 0.0 }
 0xcee   :  { %1248 = vadd.xlane.f32.xlu2 %v1247_v21 }
 0xcf6   :  { %1707 = vmax.xlane.f32.xlu2 %v1706_v14 }
 0xd08   :  { %v1240_v16 = vpop.xlane.xlu2 %1239 }
 0xd09   :  { %v1242_v19 = vsub.f32 %v1231_v60, %v1240_v16 }
 0xd0b   :  { %v1245_v38 = vmul.f32 1.442695, %v1242_v19 }
 0xd0d   :  { %2376 = vpow2.f32 %v1245_v38  ;;  %v1396_v20 = vpop.xlane.xlu1 %1395 }
 0xd0e   :  { %v1398_v22 = vsub.f32 %v1388_v62, %v1396_v20 }
 0xd10   :  { %v1401_v23 = vmul.f32 1.442695, %v1398_v22  ;;  %v1393_v17 = vpop.xlane.xlu2 %1392 }
 0xd11   :  { %v1397_v58 = vsub.f32 %v1360_v1, %v1393_v17 }
 0xd12   :  { %2378 = vpow2.f32 %v1401_v23 }
 0xd13   :  { %v3101_v24 = vpop.eup %2376  ;;  %v1399_v25 = vmul.f32 1.442695, %v1397_v58 }
 0xd14   :  { %v1250_v42 = vsel %vm1234_vm12, %v3101_v24, 0.0 }
 0xd15   :  { %2380 = vpow2.f32 %v1399_v25  ;;  %1251 = vadd.xlane.f32.xlu1 %v1250_v42  ;;  %v1552_v26 = vpop.xlane.xlu0 %1551 }
 0xd16   :  { %v1554_v27 = vsub.f32 %v1544_v2, %v1552_v26 }
 0xd18   :  { %v3105_v28 = vpop.eup %2378  ;;  %v1557_v30 = vmul.f32 1.442695, %v1554_v27  ;;  %v1549_v31 = vpop.xlane.xlu1 %1548 }
 0xd19   :  { %v1553_v32 = vsub.f32 %v1516_v4, %v1549_v31  ;;  %v1406_v33 = vsel %vm1234_vm12, %v3105_v28, 0.0 }
 0xd1a   :  { %2382 = vpow2.f32 %v1557_v30  ;;  %1407 = vadd.xlane.f32.xlu0 %v1406_v33 }
 0xd1b   :  { %v3109_v35 = vpop.eup %2380  ;;  %v1555_v15 = vmul.f32 1.442695, %v1553_v32 }
 0xd1c   :  { %v1403_v36 = vsel %vm1234_vm12, %v3109_v35, 0.0 }
 0xd1d   :  { %2384 = vpow2.f32 %v1555_v15  ;;  %1404 = vadd.xlane.f32.xlu1 %v1403_v36 }
 0xd20   :  { %v3113_v48 = vpop.eup %2382 }
 0xd21   :  { %v1562_v37 = vsel %vm1234_vm12, %v3113_v48, 0.0 }
 0xd22   :  { %1563 = vadd.xlane.f32.xlu2 %v1562_v37 }
 0xd23   :  { %v3117_v39 = vpop.eup %2384 }
 0xd24   :  { %v1559_v41 = vsel %vm1234_vm12, %v3117_v39, 0.0 }
 0xd25   :  { %1560 = vadd.xlane.f32.xlu0 %v1559_v41  ;;  %v1705_v43 = vpop.xlane.xlu0 %1704 }
 0xd26   :  { %v1709_v44 = vsub.f32 %v1672_v6, %v1705_v43 }
 0xd28   :  { %v1711_v45 = vmul.f32 1.442695, %v1709_v44 }
 0xd2a   :  { %2386 = vpow2.f32 %v1711_v45 }
 0xd30   :  { %v3121_v46 = vpop.eup %2386  ;;  %v2296_v47 = vpop.permute.xlu1 %2295 }
 0xd31   :  { %v2298_v49 = vunpack.i.h.bf16 %v2296_v47  ;;  %v2297_v50 = vunpack.i.l.bf16 %v2296_v47  ;;  %v1715_v51 = vsel %vm1234_vm12, %v3121_v46, 0.0 }
 0xd32   :  { %1716 = vadd.xlane.f32.xlu0 %v1715_v51 }
 0xd33   :  { %1304 = vmatpush.msra.mxu1 %v2298_v49  ;;  %1330 = vmatpush.msra.mxu0 %v2297_v50 }
 0xd36   :  { %2310 = vrot.lane.b32.xlu1 %v3060_v40, %s2636_s1 }
 0xd46   :  { %2305 = vrot.lane.b32.xlu0 %v3060_v40, %s2637_s20 }
 0xd61   :  { %v1249_v52 = vpop.xlane.xlu2 %1248 }
 0xd62   :  { %2388 = vrcp.f32 %v1249_v52  ;;  %v1264_v18 = vand.u32 2147483648, %v1249_v52  ;;  %v1262_v61 = vand.u32 2147483647, %v1249_v52  ;;  %vm1258_vm14 = vweird.f32 %v1249_v52 }
 0xd64   :  { %v1265_v63 = vor.u32 1.1754944e-38, %v1264_v18  ;;  %vm1263_vm3 = vcmp.eq.f32.partialorder %v1262_v61, 8.507059e+37 }
 0xd68   :  { %v2389_v53 = vpop.eup %2388 }
 0xd69   :  { %v1254_v11 = vmul.f32 %v2389_v53, %v1249_v52  ;;  %v1708_v55 = vpop.xlane.xlu2 %1707  ;;  %vm1259_vm13 = vweird.f32 %v2389_v53 }
 0xd6a   :  { %v1710_v56 = vsub.f32 %v1700_v13, %v1708_v55  ;;  %vm1260_vm15 = vmor %vm1258_vm14, %vm1259_vm13 }
 0xd6b   :  { %v1255_v57 = vsub.f32 1.0, %v1254_v11 }
 0xd6c   :  { %v1713_v59 = vmul.f32 1.442695, %v1710_v56 }
 0xd6d   :  { %v1256_v60 = vmul.f32 %v2389_v53, %v1255_v57 }
 0xd6e   :  { %2390 = vpow2.f32 %v1713_v59 }
 0xd6f   :  { %v1257_v62 = vadd.f32 %v2389_v53, %v1256_v60 }
 0xd71   :  { %v1261_v1 = vsel %vm1260_vm15, %v2389_v53, %v1257_v62 }
 0xd72   :  { %v1266_v0 = vsel %vm1263_vm3, %v1265_v63, %v1261_v1 }
 0xd73   :  { %v1267_v2 = vmul.f32 %v3096_v12, %v1266_v0 }
 0xd74   :  { %v3130_v3 = vpop.eup %2390 }
 0xd75   :  { %2224 = vmatmul.msk.f32.vlgmr.msra.gmra.mxu1 %vm247_vm2, %v1267_v2  ;;  %v1718_v4 = vsel %vm1234_vm12, %v3130_v3, 0.0 }
 0xd76   :  { %1719 = vadd.xlane.f32.xlu2 %v1718_v4 }
 0xd88   :  { %v1252_v5 = vpop.xlane.xlu1 %1251 }
 0xd89   :  { %2392 = vrcp.f32 %v1252_v5  ;;  %v1279_v9 = vand.u32 2147483648, %v1252_v5  ;;  %v1277_v12 = vand.u32 2147483647, %v1252_v5  ;;  %vm1273_vm6 = vweird.f32 %v1252_v5 }
 0xd8b   :  { %v1280_v13 = vor.u32 1.1754944e-38, %v1279_v9  ;;  %vm1278_vm8 = vcmp.eq.f32.partialorder %v1277_v12, 8.507059e+37 }
 0xd8d   :  { %v1408_v38 = vpop.xlane.xlu0 %1407 }
 0xd8e   :  { %2300 = vrot.lane.b32.xlu2 %v3060_v40, %s3361_s5  ;;  %2394 = vrcp.f32 %v1408_v38  ;;  %v1435_v43 = vand.u32 2147483648, %v1408_v38  ;;  %vm1429_vm12 = vweird.f32 %v1408_v38  ;;  %v1433_v49 = vand.u32 2147483647, %v1408_v38  ;;  %s3368_s5 = smov 1  }
 0xd8f   :  { %v2393_v6 = vpop.eup %2392 }
 0xd90   :  { %v1269_v7 = vmul.f32 %v2393_v6, %v1252_v5  ;;  %vm1274_vm5 = vweird.f32 %v2393_v6  ;;  %v1405_v40 = vpop.xlane.xlu1 %1404  ;;  %v1436_v55 = vor.u32 1.1754944e-38, %v1435_v43  ;;  %vm1434_vm3 = vcmp.eq.f32.partialorder %v1433_v49, 8.507059e+37 }
 0xd91   :  { %vm1275_vm7 = vmor %vm1273_vm6, %vm1274_vm5  ;;  %2396 = vrcp.f32 %v1405_v40  ;;  %v1420_v50 = vand.u32 2147483648, %v1405_v40  ;;  %vm1414_vm14 = vweird.f32 %v1405_v40  ;;  %v1418_v51 = vand.u32 2147483647, %v1405_v40 }
 0xd92   :  { %v1270_v8 = vsub.f32 1.0, %v1269_v7 }
 0xd93   :  { %v1421_v18 = vor.u32 1.1754944e-38, %v1420_v50  ;;  %vm1419_vm5 = vcmp.eq.f32.partialorder %v1418_v51, 8.507059e+37 }
 0xd94   :  { %v1271_v10 = vmul.f32 %v2393_v6, %v1270_v8  ;;  %v2395_v23 = vpop.eup %2394 }
 0xd95   :  { %v3139_v20 = vpop.xlane.xlu2 %1563  ;;  %v1425_v58 = vmul.f32 %v2395_v23, %v1408_v38  ;;  %vm1430_vm10 = vweird.f32 %v2395_v23 }
 0xd96   :  { %v1272_v21 = vadd.f32 %v2393_v6, %v1271_v10  ;;  %2398 = vrcp.f32 %v3139_v20  ;;  %vm1431_vm13 = vmor %vm1429_vm12, %vm1430_vm10  ;;  %vm1585_vm6 = vweird.f32 %v3139_v20  ;;  %v1589_v1 = vand.u32 2147483647, %v3139_v20 }
 0xd97   :  { %v2397_v17 = vpop.eup %2396  ;;  %v1591_v0 = vand.u32 2147483648, %v3139_v20 }
 0xd98   :  { %v1276_v14 = vsel %vm1275_vm7, %v2393_v6, %v1272_v21  ;;  %v3141_v22 = vpop.xlane.xlu0 %1560  ;;  %v1410_v25 = vmul.f32 %v2397_v17, %v1405_v40  ;;  %vm1415_vm11 = vweird.f32 %v2397_v17 }
 0xd99   :  { %v1281_v16 = vsel %vm1278_vm8, %v1280_v13, %v1276_v14  ;;  %2400 = vrcp.f32 %v3141_v22  ;;  %vm1416_vm15 = vmor %vm1414_vm14, %vm1415_vm11  ;;  %vm1570_vm11 = vweird.f32 %v3141_v22  ;;  %v1576_v8 = vand.u32 2147483648, %v3141_v22 }
 0xd9a   :  { %v1282_v19 = vmul.f32 %v3101_v24, %v1281_v16  ;;  %v1426_v24 = vsub.f32 1.0, %v1425_v58  ;;  %v1411_v27 = vsub.f32 1.0, %v1410_v25  ;;  %v1574_v13 = vand.u32 2147483647, %v3141_v22 }
 0xd9b   :  { %v1577_v25 = vor.u32 1.1754944e-38, %v1576_v8 }
 0xd9c   :  { %2225 = vmatmul.msk.f32.vlgmr.msra.gmra.mxu0 %vm247_vm2, %v1282_v19  ;;  %v3145_v42 = vpop.eup %2398  ;;  %v1427_v31 = vmul.f32 %v2395_v23, %v1426_v24  ;;  %v1412_v15 = vmul.f32 %v2397_v17, %v1411_v27  ;;  %vm1575_vm14 = vcmp.eq.f32.partialorder %v1574_v13, 8.507059e+37 }
 0xd9d   :  { %v1581_v32 = vmul.f32 %v3145_v42, %v3139_v20  ;;  %vm1586_vm7 = vweird.f32 %v3145_v42 }
 0xd9e   :  { %v1428_v36 = vadd.f32 %v2395_v23, %v1427_v31  ;;  %v1413_v44 = vadd.f32 %v2397_v17, %v1412_v15  ;;  %vm3176_vm10 = vmor %vm1585_vm6, %vm1586_vm7 }
 0xd9f   :  { %v3147_v26 = vpop.eup %2400  ;;  %v1582_v37 = vsub.f32 1.0, %v1581_v32 }
 0xda0   :  { %v1566_v33 = vmul.f32 %v3147_v26, %v3141_v22  ;;  %v1432_v52 = vsel %vm1431_vm13, %v2395_v23, %v1428_v36  ;;  %v1417_v56 = vsel %vm1416_vm15, %v2397_v17, %v1413_v44  ;;  %vm1571_vm8 = vweird.f32 %v3147_v26 }
 0xda1   :  { %v1583_v53 = vmul.f32 %v3145_v42, %v1582_v37  ;;  %v1437_v59 = vsel %vm1434_vm3, %v1436_v55, %v1432_v52  ;;  %v1422_v61 = vsel %vm1419_vm5, %v1421_v18, %v1417_v56  ;;  %vm3182_vm12 = vmor %vm1570_vm11, %vm1571_vm8  ;;  %vm1590_vm13 = vcmp.eq.f32.partialorder %v1589_v1, 8.507059e+37  ;;  %v2246_v56 = vld [vmem:[%s3334_s6 + $0x30] sm:$0xff]  ;;  %v2244_v18 = vld [vmem:[%s3334_s6 + $0x20] sm:$0xff] }
 0xda2   :  { %v1567_v41 = vsub.f32 1.0, %v1566_v33  ;;  %v1423_v16 = vmul.f32 %v3109_v35, %v1422_v61  ;;  %v1438_v19 = vmul.f32 %v3105_v28, %v1437_v59  ;;  %v1592_v28 = vor.u32 1.1754944e-38, %v1591_v0 }
 0xda3   :  { %v1584_v62 = vadd.f32 %v3145_v42, %v1583_v53 }
 0xda4   :  { %v1568_v11 = vmul.f32 %v3147_v26, %v1567_v41 }
 0xda5   :  { %v3149_v30 = vpop.xlane.xlu0 %1716  ;;  %v1588_v38 = vsel %vm3176_vm10, %v3145_v42, %v1584_v62 }
 0xda6   :  { %2402 = vrcp.f32 %v3149_v30  ;;  %v1569_v63 = vadd.f32 %v3147_v26, %v1568_v11  ;;  %v1593_v42 = vsel %vm1590_vm13, %v1592_v28, %v1588_v38  ;;  %vm1726_vm5 = vweird.f32 %v3149_v30 }
 0xda7   :  { %v1730_v31 = vand.u32 2147483647, %v3149_v30  ;;  %v1732_v32 = vand.u32 2147483648, %v3149_v30  ;;  %v1594_v37 = vmul.f32 %v3113_v48, %v1593_v42 }
 0xda8   :  { %v2311_v9 = vpop.permute.xlu1 %2310  ;;  %v1573_v40 = vsel %vm3182_vm12, %v3147_v26, %v1569_v63  ;;  %vm1846_vm12 = vcmask 1041409  }
 0xda9   :  { %v2313_v22 = vunpack.i.h.bf16 %v2311_v9  ;;  %v2312_v58 = vunpack.i.l.bf16 %v2311_v9  ;;  %v1578_v24 = vsel %vm1575_vm14, %v1577_v25, %v1573_v40  ;;  %vm1731_vm10 = vcmp.eq.f32.partialorder %v1730_v31, 8.507059e+37 }
 0xdaa   :  { %v1579_v36 = vmul.f32 %v3117_v39, %v1578_v24 }
 0xdac   :  { %v3158_v47 = vpop.eup %2402 }
 0xdad   :  { %v1722_v57 = vmul.f32 %v3158_v47, %v3149_v30  ;;  %vm1727_vm15 = vweird.f32 %v3158_v47  ;;  %v1733_v30 = vor.u32 1.1754944e-38, %v1732_v32  ;;  %v2254_v32 = vld [vmem:[%s3338_s10 + $0x38] sm:$0xff] }
 0xdae   :  { %vm1728_vm6 = vmor %vm1726_vm5, %vm1727_vm15  ;;  %1986 = vmatpush.msrb.mxu3 %v2254_v32 }
 0xdaf   :  { %v1723_v2 = vsub.f32 1.0, %v1722_v57  ;;  %v2245_v57 = vld [vmem:[%s3334_s6 + $0x28] sm:$0xff] }
 0xdb1   :  { %v1724_v17 = vmul.f32 %v3158_v47, %v1723_v2 }
 0xdb3   :  { %v1725_v26 = vadd.f32 %v3158_v47, %v1724_v17 }
 0xdb5   :  { %v1729_v41 = vsel %vm1728_vm6, %v3158_v47, %v1725_v26 }
 0xdb6   :  { %v1734_v49 = vsel %vm1731_vm10, %v1733_v30, %v1729_v41  ;;  %v2264_v30 = vld [vmem:[%s3340_s12 + $0x78] sm:$0xff] }
 0xdb8   :  { %v2306_v4 = vpop.permute.xlu0 %2305 }
 0xdb9   :  { %v2308_v20 = vunpack.i.h.bf16 %v2306_v4  ;;  %v2307_v23 = vunpack.i.l.bf16 %v2306_v4 }
 0xde9   :  { %v3156_v45 = vpop.xlane.xlu2 %1719 }
 0xdea   :  { %2404 = vrcp.f32 %v3156_v45  ;;  %v1747_v33 = vand.u32 2147483648, %v3156_v45  ;;  %vm1741_vm7 = vweird.f32 %v3156_v45  ;;  %v1745_v15 = vand.u32 2147483647, %v3156_v45 }
 0xdec   :  { %v1748_v44 = vor.u32 1.1754944e-38, %v1747_v33  ;;  %vm1746_vm11 = vcmp.eq.f32.partialorder %v1745_v15, 8.507059e+37  ;;  %v2253_v33 = vld [vmem:[%s3338_s10 + $0x30] sm:$0xff] }
 0xded   :  { %1987 = vmatpush.msrb.mxu3 %v2253_v33 }
 0xdf0   :  { %v3167_v60 = vpop.eup %2404 }
 0xdf1   :  { %v1737_v5 = vmul.f32 %v3167_v60, %v3156_v45  ;;  %v2301_v6 = vpop.permute.xlu2 %2300  ;;  %vm1742_vm3 = vweird.f32 %v3167_v60  ;;  %v1735_v45 = vmul.f32 %v3121_v46, %v1734_v49 }
 0xdf2   :  { %v2303_v10 = vunpack.i.h.bf16 %v2301_v6  ;;  %v2302_v12 = vunpack.i.l.bf16 %v2301_v6  ;;  %vm1743_vm8 = vmor %vm1741_vm7, %vm1742_vm3  ;;  %v1306_v48 = vpop.f32.mrf.mxu1 }
 0xdf3   :  { %v1738_v14 = vsub.f32 1.0, %v1737_v5 }
 0xdf4   :  { %1460 = vmatpush.msrb.mxu1 %v2303_v10  ;;  %1486 = vmatpush.msrb.mxu0 %v2302_v12  ;;  %v2324_v10 = vld [vmem:[%s3335_s7 + $0x1] ss:$0 sm:$0xff] }
 0xdf5   :  { %v1739_v35 = vmul.f32 %v3167_v60, %v1738_v14  ;;  %2230 = vmatmul.msk.f32.vlgmr.msrb.gmra.mxu1 %vm247_vm2, %v1423_v16  ;;  %2231 = vmatmul.msk.f32.vlgmr.msrb.gmra.mxu0 %vm247_vm2, %v1438_v19 }
 0xdf6   :  { %1616 = vmatpush.msra.mxu1 %v2308_v20  ;;  %1642 = vmatpush.msra.mxu0 %v2307_v23 }
 0xdf7   :  { %v1740_v27 = vadd.f32 %v3167_v60, %v1739_v35 }
 0xdf8   :  { %1772 = vmatpush.msrb.mxu1 %v2313_v22  ;;  %1798 = vmatpush.msrb.mxu0 %v2312_v58 }
 0xdf9   :  { %v1744_v43 = vsel %vm1743_vm8, %v3167_v60, %v1740_v27 }
 0xdfa   :  { %v1749_v50 = vsel %vm1746_vm11, %v1748_v44, %v1744_v43  ;;  %v2263_v44 = vld [vmem:[%s3340_s12 + $0x70] sm:$0xff] }
 0xdfb   :  { %v1750_v39 = vmul.f32 %v3130_v3, %v1749_v50  ;;  %v2247_v3 = vld [vmem:[%s3334_s6 + $0x38] sm:$0xff]  ;;  %v2262_v50 = vld [vmem:[%s3340_s12 + $0x68] sm:$0xff] }
 0xdfc   :  { %1862 = vmatpush.msrb.mxu2 %v2247_v3 }
 0xdfd   :  { %2236 = vmatmul.msk.f32.vlgmr.msra.gmra.mxu1 %vm247_vm2, %v1579_v36  ;;  %2237 = vmatmul.msk.f32.vlgmr.msra.gmra.mxu0 %vm247_vm2, %v1594_v37  ;;  %v2252_v36 = vld [vmem:[%s3338_s10 + $0x28] sm:$0xff]  ;;  %v2251_v37 = vld [vmem:[%s3338_s10 + $0x20] sm:$0xff] }
 0xdfe   :  { %1863 = vmatpush.msrb.mxu2 %v2246_v56  ;;  %1988 = vmatpush.msrb.mxu3 %v2252_v36 }
 0xdff   :  { %2020 = vmatpush.msra.mxu1 %v2264_v30 }
 0xe00   :  { %1864 = vmatpush.msrb.mxu2 %v2245_v57  ;;  %1989 = vmatpush.msrb.mxu3 %v2251_v37 }
 0xe01   :  { %2021 = vmatpush.msra.mxu1 %v2263_v44 }
 0xe02   :  { %1865 = vmatpush.msrb.mxu2 %v2244_v18 }
 0xe03   :  { %2022 = vmatpush.msra.mxu1 %v2262_v50 }
 0xe05   :  { %2242 = vmatmul.msk.f32.vlgmr.msrb.gmra.mxu1 %vm247_vm2, %v1735_v45  ;;  %2243 = vmatmul.msk.f32.vlgmr.msrb.gmra.mxu0 %vm247_vm2, %v1750_v39 }
 0xe19   :  { %v1332_v47 = vpop.f32.mrf.mxu0 }
 0xe72   :  { %v1462_v51 = vpop.f32.mrf.mxu1  ;;  %v1488_v52 = vpop.f32.mrf.mxu0 }
 0xe73   :  { %1805 = vrot.lane.b32.xlu0 %v1462_v51, %s3366_s25  ;;  %1807 = vrot.lane.b32.xlu1 %v1488_v52, %s3366_s25  ;;  %v2260_v51 = vld [vmem:[%s3340_s12 + $0x58] sm:$0xff] }
 0xe7a   :  { %v1618_v53 = vpop.f32.mrf.mxu1  ;;  %v1644_v11 = vpop.f32.mrf.mxu0 }
 0xe7b   :  { %1815 = vrot.lane.b32.xlu2 %v1644_v11, %s3360_s19 }
 0xe82   :  { %v1774_v55 = vpop.f32.mrf.mxu1  ;;  %v1800_v46 = vpop.f32.mrf.mxu0 }
 0xe83   :  { %1821 = vrot.lane.b32.xlu0 %v1774_v55, %s2638_s2  ;;  %1813 = vrot.lane.b32.xlu2 %v1618_v53, %s3360_s19 }
 0xe84   :  { %1823 = vrot.lane.b32.xlu1 %v1800_v46, %s2638_s2 }
 0xed5   :  { %v1816_v59 = vpop.permute.xlu2 %1815 }
 0xedd   :  { %v1814_v4 = vpop.permute.xlu2 %1813 }
 0xee5   :  { %v1808_v60 = vpop.permute.xlu1 %1807  ;;  %v1806_v61 = vpop.permute.xlu0 %1805 }
 0xee6   :  { %v1828_v62 = vsel %vm247_vm2, %v1332_v47, %v1808_v60  ;;  %v1827_v63 = vsel %vm247_vm2, %v1306_v48, %v1806_v61  ;;  %vm1886_vm2 = vcmask 261127   ;;  %v2261_v48 = vld [vmem:[%s3340_s12 + $0x60] sm:$0xff] }
 0xee7   :  { %v1830_v0 = vsel %vm173_vm0, %v1828_v62, %v1816_v59  ;;  %v1829_v6 = vsel %vm173_vm0, %v1827_v63, %v1814_v4  ;;  %vm1890_vm0 = vcmask 253952   ;;  %2023 = vmatpush.msra.mxu1 %v2261_v48  ;;  %v2325_v59 = vld [vmem:[#allocation10 + $0x1] ss:$0 sm:$0xff] }
 0xee9   :  { %2024 = vmatpush.msra.mxu1 %v2260_v51 }
 0xef5   :  { %v1822_v1 = vpop.permute.xlu0 %1821 }
 0xef6   :  { %v1824_v2 = vpop.permute.xlu1 %1823  ;;  %v1831_v8 = vsel %vm895_vm9, %v1829_v6, %v1822_v1 }
 0xef7   :  { %v1832_v5 = vsel %vm895_vm9, %v1830_v0, %v1824_v2  ;;  %v2326_v0 = vld [vmem:[%s3337_s9 + $0x1] ss:$0 sm:$0xff] }
 0xef8   :  { %v1845_v7 = vrot.slane %v1832_v5, 7 }
 0xefa   :  { %v1847_v9 = vsel %vm1846_vm12, %v1845_v7, %v1831_v8 }
 0xefb   :  { %2249 = vmatmul.msk.f32.vlgmr.msrb.gmra.mxu2 %vm214_vm1, %v1847_v9 }
 0xf7e   :  { %v1867_v12 = vpop.f32.mrf.mxu2 }
 0xf7f   :  { %v1868_v21 = vadd.f32 %v2324_v10, %v1867_v12  ;;  %v2259_v10 = vld [vmem:[%s3340_s12 + $0x50] sm:$0xff]  ;;  %v2258_v12 = vld [vmem:[%s3340_s12 + $0x48] sm:$0xff] }
 0xf80   :  { %2025 = vmatpush.msra.mxu1 %v2259_v10 }
 0xf81   :  { %v1871_v13 = vrot.slane %v1868_v21, 1  ;;  %v1872_v14 = vrot.slane %v1868_v21, 2  ;;  %v2257_v21 = vld [vmem:[%s3340_s12 + $0x40] sm:$0xff] }
 0xf82   :  { %2026 = vmatpush.msra.mxu1 %v2258_v12  ;;  %v2331_v12 = vld [vmem:[%s3345_s17] ss:$0 sm:$0xff] }
 0xf83   :  { %v1875_v16 = vadd.f32 %v1871_v13, %v3044_v29  ;;  %v1876_v19 = vadd.f32 %v1872_v14, %v3048_v34  ;;  %v2327_v13 = vld [vmem:[%s3339_s11 + $0x1] ss:$0 sm:$0xff] }
 0xf84   :  { %2027 = vmatpush.msra.mxu1 %v2257_v21 }
 0xf85   :  { %v1887_v38 = vsel %vm1886_vm2, %v1875_v16, 0.0  ;;  %v1883_v40 = vrot.slane %v1876_v19, 7 }
 0xf86   :  { %1888 = vadd.xlane.f32.xlu2 %v1887_v38  ;;  %v2328_v38 = vld [vmem:[%s3341_s13 + $0x1] ss:$0 sm:$0xff] }
 0xf87   :  { %v1891_v20 = vsel %vm1890_vm0, %v1883_v40, 0.0 }
 0xf88   :  { %1892 = vadd.xlane.f32.xlu1 %v1891_v20 }
 0xff9   :  { %v1889_v23 = vpop.xlane.xlu2 %1888 }
 0xffa   :  { %v1894_v17 = vmul.f32 %v1889_v23, %v2964_v54 }
 0xffb   :  { %v1893_v22 = vpop.xlane.xlu1 %1892 }
 0xffc   :  { %v1901_v58 = vsub.f32 %v1875_v16, %v1894_v17  ;;  %v1895_v35 = vmul.f32 %v1893_v22, %v2964_v54 }
 0xffe   :  { %v1898_v28 = vrot.slane %v1895_v35, 1  ;;  %v1903_v25 = vmul.f32 %v1901_v58, %v1901_v58 }
0x1000   :  { %v1902_v29 = vsub.f32 %v1876_v19, %v1898_v28  ;;  %v1910_v34 = vsel %vm1886_vm2, %v1903_v25, 0.0 }
0x1001   :  { %1911 = vadd.xlane.f32.xlu2 %v1910_v34 }
0x1002   :  { %v1904_v42 = vmul.f32 %v1902_v29, %v1902_v29 }
0x1004   :  { %v1907_v24 = vrot.slane %v1904_v42, 7 }
0x1006   :  { %v1913_v26 = vsel %vm1890_vm0, %v1907_v24, 0.0 }
0x1007   :  { %1914 = vadd.xlane.f32.xlu0 %v1913_v26 }
0x1074   :  { %v1912_v27 = vpop.xlane.xlu2 %1911 }
0x1075   :  { %v1916_v31 = vmul.f32 %v1912_v27, %v2964_v54 }
0x1077   :  { %v1918_v15 = vadd.f32 1e-05, %v1916_v31 }
0x1079   :  { %2406 = vrsqrt.f32 %v1918_v15  ;;  %vm1926_vm13 = vweird.f32 %v1918_v15 }
0x107a   :  { %v1915_v41 = vpop.xlane.xlu0 %1914 }
0x107b   :  { %v1917_v43 = vmul.f32 %v1915_v41, %v2964_v54  ;;  %v2120_v41 = vld [vmem:[#allocation13 + $0x18] sm:$0xff] }
0x107c   :  { %2144 = vmatpush.msra.mxu0 %v2120_v41 }
0x107d   :  { %v1919_v49 = vadd.f32 1e-05, %v1917_v43  ;;  %v2119_v43 = vld [vmem:[#allocation13 + $0x10] sm:$0xff] }
0x107e   :  { %2145 = vmatpush.msra.mxu0 %v2119_v43 }
0x107f   :  { %v2407_v45 = vpop.eup %2406  ;;  %2408 = vrsqrt.f32 %v1919_v49  ;;  %vm1936_vm3 = vweird.f32 %v1919_v49 }
0x1080   :  { %v1921_v39 = vmul.f32 %v2407_v45, %v1918_v15  ;;  %vm1927_vm9 = vweird.f32 %v2407_v45 }
0x1081   :  { %vm1928_vm14 = vmor %vm1926_vm13, %vm1927_vm9 }
0x1082   :  { %v1922_v47 = vmul.f32 %v2407_v45, %v1921_v39 }
0x1084   :  { %v1923_v52 = vmul.f32 0.5, %v1922_v47 }
0x1085   :  { %v2409_v53 = vpop.eup %2408 }
0x1086   :  { %v1924_v11 = vsub.f32 1.5, %v1923_v52  ;;  %v1931_v55 = vmul.f32 %v2409_v53, %v1919_v49  ;;  %vm1937_vm15 = vweird.f32 %v2409_v53  ;;  %v2118_v49 = vld [vmem:[#allocation13 + $0x8] sm:$0xff] }
0x1087   :  { %vm1938_vm5 = vmor %vm1936_vm3, %vm1937_vm15  ;;  %2146 = vmatpush.msra.mxu0 %v2118_v49 }
0x1088   :  { %v1925_v46 = vmul.f32 %v2407_v45, %v1924_v11  ;;  %v1932_v3 = vmul.f32 %v2409_v53, %v1931_v55 }
0x108a   :  { %v1929_v56 = vsel %vm1928_vm14, %v2407_v45, %v1925_v46  ;;  %v1933_v57 = vmul.f32 0.5, %v1932_v3  ;;  %v2117_v45 = vld [vmem:[#allocation13] sm:$0xff] }
0x108b   :  { %v1945_v60 = vmul.f32 %v1929_v56, %v1901_v58  ;;  %2147 = vmatpush.msra.mxu0 %v2117_v45 }
0x108c   :  { %v1934_v18 = vsub.f32 1.5, %v1933_v57 }
0x108d   :  { %v1950_v63 = vmul.f32 %v2325_v59, %v1945_v60 }
0x108e   :  { %v1935_v61 = vmul.f32 %v2409_v53, %v1934_v18 }
0x108f   :  { %v1955_v5 = vadd.f32 %v2326_v0, %v1950_v63 }
0x1090   :  { %v1939_v62 = vsel %vm1938_vm5, %v2409_v53, %v1935_v61  ;;  %v2329_v61 = vld [vmem:[#allocation11 + $0x1] ss:$0 sm:$0xff] }
0x1091   :  { %v1942_v1 = vrot.slane %v1939_v62, 1  ;;  %v1969_v7 = vrot.slane %v1955_v5, 7 }
0x1093   :  { %v1946_v2 = vmul.f32 %v1942_v1, %v1902_v29 }
0x1095   :  { %v1951_v4 = vmul.f32 %v2325_v59, %v1946_v2  ;;  %v2330_v2 = vld [vmem:[%s3343_s15 + $0x1] ss:$0 sm:$0xff]  ;;  %s3367_s15 = sld [smem:[#allocation23_spill]] }
0x1097   :  { %v1956_v6 = vadd.f32 %v2326_v0, %v1951_v4 }
0x1099   :  { %v1970_v8 = vrot.slane %v1956_v6, 6 }
0x109b   :  { %v1971_v9 = vsel %vm1846_vm12, %v1970_v8, %v1969_v7  ;;  %s2163_s30 = sshll.u32 %s3367_s15, 4  ;;  %s2164_s30 = int_to_ptr.hbm [resolvable:$true] %s2163_s30 }
0x109c   :  { %2256 = vmatmul.msk.f32.vlgmr.msrb.gmra.mxu3 %vm214_vm1, %v1971_v9 }
0x111f   :  { %v1991_v14 = vpop.f32.mrf.mxu3 }
0x1120   :  { %v1992_v16 = vadd.f32 %v2327_v13, %v1991_v14 }
0x1122   :  { %v1994_v19 = vmax.f32 %v1992_v16, 0.0 }
0x1124   :  { %2266 = vmatmul.msk.f32.vlgmr.msra.gmra.mxu1 %vm1051_vm4, %v1994_v19 }
0x11a1   :  { %v2029_v40 = vpop.f32.mrf.mxu1 }
0x11a2   :  { %v2030_v20 = vadd.f32 %v2328_v38, %v2029_v40 }
0x11a4   :  { %v2033_v23 = vrot.slane %v2030_v20, 1  ;;  %v2034_v17 = vrot.slane %v2030_v20, 2 }
0x11a6   :  { %v2037_v22 = vadd.f32 %v2033_v23, %v1955_v5  ;;  %v2038_v58 = vadd.f32 %v2034_v17, %v1956_v6 }
0x11a8   :  { %v2048_v35 = vsel %vm1886_vm2, %v2037_v22, 0.0  ;;  %v2045_v28 = vrot.slane %v2038_v58, 7 }
0x11a9   :  { %2049 = vadd.xlane.f32.xlu0 %v2048_v35 }
0x11aa   :  { %v2051_v25 = vsel %vm1890_vm0, %v2045_v28, 0.0 }
0x11ab   :  { %2052 = vadd.xlane.f32.xlu1 %v2051_v25 }
0x121c   :  { %v2050_v29 = vpop.xlane.xlu0 %2049 }
0x121d   :  { %v2054_v34 = vmul.f32 %v2050_v29, %v2964_v54 }
0x121e   :  { %v2053_v42 = vpop.xlane.xlu1 %2052 }
0x121f   :  { %v2061_v24 = vsub.f32 %v2037_v22, %v2054_v34  ;;  %v2055_v26 = vmul.f32 %v2053_v42, %v2964_v54 }
0x1221   :  { %v2058_v27 = vrot.slane %v2055_v26, 1  ;;  %v2063_v31 = vmul.f32 %v2061_v24, %v2061_v24 }
0x1223   :  { %v2062_v32 = vsub.f32 %v2038_v58, %v2058_v27  ;;  %v2070_v33 = vsel %vm1886_vm2, %v2063_v31, 0.0 }
0x1224   :  { %2071 = vadd.xlane.f32.xlu1 %v2070_v33 }
0x1225   :  { %v2064_v15 = vmul.f32 %v2062_v32, %v2062_v32 }
0x1227   :  { %v2067_v36 = vrot.slane %v2064_v15, 7 }
0x1229   :  { %v2073_v37 = vsel %vm1890_vm0, %v2067_v36, 0.0 }
0x122a   :  { %2074 = vadd.xlane.f32.xlu2 %v2073_v37 }
0x1297   :  { %v2072_v30 = vpop.xlane.xlu1 %2071 }
0x1298   :  { %v2076_v44 = vmul.f32 %v2072_v30, %v2964_v54 }
0x129a   :  { %v2078_v50 = vadd.f32 1e-05, %v2076_v44 }
0x129c   :  { %2410 = vrsqrt.f32 %v2078_v50  ;;  %vm2086_vm6 = vweird.f32 %v2078_v50 }
0x129d   :  { %v2075_v39 = vpop.xlane.xlu2 %2074 }
0x129e   :  { %v2077_v48 = vmul.f32 %v2075_v39, %v2964_v54 }
0x12a0   :  { %v2079_v47 = vadd.f32 1e-05, %v2077_v48 }
0x12a2   :  { %v2411_v51 = vpop.eup %2410  ;;  %2412 = vrsqrt.f32 %v2079_v47  ;;  %vm2096_vm10 = vweird.f32 %v2079_v47 }
0x12a3   :  { %v2081_v52 = vmul.f32 %v2411_v51, %v2078_v50  ;;  %vm2087_vm4 = vweird.f32 %v2411_v51 }
0x12a4   :  { %vm2088_vm7 = vmor %vm2086_vm6, %vm2087_vm4 }
0x12a5   :  { %v2082_v53 = vmul.f32 %v2411_v51, %v2081_v52 }
0x12a7   :  { %v2083_v11 = vmul.f32 0.5, %v2082_v53 }
0x12a8   :  { %v2413_v55 = vpop.eup %2412 }
0x12a9   :  { %v2084_v46 = vsub.f32 1.5, %v2083_v11  ;;  %v2091_v3 = vmul.f32 %v2413_v55, %v2079_v47  ;;  %vm2097_vm8 = vweird.f32 %v2413_v55 }
0x12aa   :  { %vm2098_vm11 = vmor %vm2096_vm10, %vm2097_vm8 }
0x12ab   :  { %v2085_v56 = vmul.f32 %v2411_v51, %v2084_v46  ;;  %v2092_v57 = vmul.f32 %v2413_v55, %v2091_v3 }
0x12ad   :  { %v2089_v18 = vsel %vm2088_vm7, %v2411_v51, %v2085_v56  ;;  %v2093_v59 = vmul.f32 0.5, %v2092_v57 }
0x12ae   :  { %v2105_v54 = vmul.f32 %v2089_v18, %v2061_v24 }
0x12af   :  { %v2094_v60 = vsub.f32 1.5, %v2093_v59 }
0x12b0   :  { %v2110_v1 = vmul.f32 %v2329_v61, %v2105_v54 }
0x12b1   :  { %v2095_v62 = vmul.f32 %v2413_v55, %v2094_v60 }
0x12b2   :  { %v2115_v6 = vadd.f32 %v2330_v2, %v2110_v1 }
0x12b3   :  { %v2099_v63 = vsel %vm2098_vm11, %v2413_v55, %v2095_v62 }
0x12b4   :  { %v2102_v0 = vrot.slane %v2099_v63, 1  ;;  %v2127_v8 = vrot.slane %v2115_v6, 7 }
0x12b6   :  { %v2106_v4 = vmul.f32 %v2102_v0, %v2062_v32 }
0x12b8   :  { %v2111_v5 = vmul.f32 %v2329_v61, %v2106_v4 }
0x12ba   :  { %v2116_v7 = vadd.f32 %v2330_v2, %v2111_v5 }
0x12bc   :  { %v2128_v9 = vrot.slane %v2116_v7, 6 }
0x12be   :  { %v2129_v10 = vsel %vm1846_vm12, %v2128_v9, %v2127_v8 }
0x12bf   :  { %2268 = vmatmul.msk.f32.vlgmr.msra.gmra.mxu0 %vm214_vm1, %v2129_v10 }
0x133c   :  { %v2149_v21 = vpop.f32.mrf.mxu0 }
0x133d   :  { %v2150_v13 = vadd.f32 %v2331_v12, %v2149_v21 }
0x133f   :  { %v2153_v14 = vrot.slane %v2150_v13, 1  ;;  %2155 = vst [vmem:[#allocation14] sm:$0x1] %v2150_v13 }
0x1341   :  { %2156 = vst [vmem:[#allocation14 + $0x1] sm:$0x1] %v2153_v14 }
0x1342   :  { %2169 = dma.vmem_to_hbm [thread:$0]  %s2162_s4, 32, %s2164_s30, [#allocation4], %s3360_s19, %s3360_s19, %s3368_s5  }
0x1343   :  { %2614 = dma.done.wait [#allocation4], 32  }
0x1344   :  { %2615 = vsyncadd [#allocation4], 4294967264 }
0x1345   :  { %2174 = vsyncpa [#allocation3], 1 }
0x1346   :  { %2175 = vsyncpa [#allocation6], 1 }
0x1347   :  { %2176 = vsyncpa [#allocation9], 1 }
0x1348   :  { %2177 = vsyncpa [#allocation12], 1 }
0x1349   :  { %2178 = vsyncpa [#allocation4], 1 }

</bundles_post_ra>
